<compile_context>
chip_gen: v6e
topology: v6e:2x2x1
jax: 0.10.0
libtpu: 0.0.40
codegen_flags: <defaults>
</compile_context>

<pallas_src>
import functools

import jax
import jax.numpy as jnp
from jax import lax
from jax.experimental import pallas as pl
from jax.experimental.pallas import tpu as pltpu

_LN_EPS = 1e-6          # custom LayerNorm: unbiased std (torch.std), eps added to std
_LANE, _SUB = 128, 8    # TPU vreg tile


def _layer_norm(h, gain, bias):
    d = h.shape[-1]
    mean = jnp.mean(h, axis=-1, keepdims=True)
    var = jnp.sum((h - mean) ** 2, axis=-1, keepdims=True) / (d - 1)   # torch.std (unbiased)
    return gain * (h - mean) / (jnp.sqrt(var) + _LN_EPS) + bias


# ----------------------------------------------------------------------------------
# Fused kernel: SelfAttention -> RNN encoder -> LayerNorm -> TemporalConvNet -> decoder
# ----------------------------------------------------------------------------------
def tcn_fused_kernel(x_ref, slab_ref, o_ref, *, entries, block_flags,
                     batch, seq, feat, d_model):
    def w(name):                      # static slice of the packed weight slab
        off, r, c = entries[name]
        return slab_ref[off:off + r, :c]

    bs = batch * seq
    x3 = x_ref[...]                                                    # (B, S, F)
    xf = x3.reshape(bs, feat)                                          # b-major rows

    # ---- SelfAttention -----------------------------------------------------------
    # TODO(synk): SelfAttention is not defined in the provided source; implemented as
    # single-head scaled-dot-product attention + output proj + residual + LayerNorm.
    qkv = jnp.dot(xf, w("wqkv"), preferred_element_type=jnp.float32) + w("bqkv")
    qkv3 = qkv.reshape(batch, seq, 3 * feat)
    q, k, v = qkv3[..., :feat], qkv3[..., feat:2 * feat], qkv3[..., 2 * feat:]
    # trans_b-style batched matmul: contract last dims, batch over dim 0 (no K copy).
    scores = lax.dot_general(q, k, (((2,), (2,)), ((0,), (0,))),
                             preferred_element_type=jnp.float32) * (1.0 / (feat ** 0.5))
    m = jnp.max(scores, axis=-1, keepdims=True)
    e = jnp.exp(scores - m)
    p = e / jnp.sum(e, axis=-1, keepdims=True)
    ctx = lax.dot_general(p, v, (((2,), (1,)), ((0,), (0,))),
                          preferred_element_type=jnp.float32)          # (B, S, F)
    attn = jnp.dot(ctx.reshape(bs, feat), w("wo"),
                   preferred_element_type=jnp.float32) + w("bo")
    h = _layer_norm(attn + xf, w("ln_a"), w("ln_b"))                   # (B*S, F)

    # ---- Time_Embeddings: vanilla tanh RNN, batched (B, D) state, h0 = 0 ----------
    # Input projection + bias hoisted out of the serial recurrence; the (B,S,D)
    # output is assembled via masked accumulation (no concat/stack copies).
    xp = jnp.dot(h, w("w_ih"), preferred_element_type=jnp.float32) + w("b_rnn")
    xp3 = xp.reshape(batch, seq, d_model)
    whh = w("w_hh")
    t_idx = lax.broadcasted_iota(jnp.int32, (batch, seq, d_model), 1)  # hoisted once
    hstate = jnp.zeros((batch, d_model), jnp.float32)
    emb = jnp.zeros((batch, seq, d_model), jnp.float32)
    for t in range(seq):                                               # S is static
        hstate = jnp.tanh(xp3[:, t, :]
                          + jnp.dot(hstate, whh, preferred_element_type=jnp.float32))
        emb = emb + jnp.where(t_idx == t, hstate[:, None, :], 0.0)
    y = _layer_norm(emb.reshape(bs, d_model), w("ln2_a"), w("ln2_b"))  # (B*S, D)

    # ---- TemporalConvNet -----------------------------------------------------------
    # 2-tap dilated causal conv (kernel_size=2, chomped), concat-free:
    #   out = (Shift_d @ y) @ W_tap0 + y @ W_tap1 + b       (all MXU)
    for i, has_ds in enumerate(block_flags):
        shift = w(f"blk{i}_shift")                                     # (B*S, B*S)
        sy = jnp.dot(shift, y, preferred_element_type=jnp.float32)
        out = jnp.maximum(
            jnp.dot(sy, w(f"blk{i}_w1t0"), preferred_element_type=jnp.float32)
            + jnp.dot(y, w(f"blk{i}_w1t1"), preferred_element_type=jnp.float32)
            + w(f"blk{i}_b1"), 0.0)                                    # conv1+chomp+relu
        so = jnp.dot(shift, out, preferred_element_type=jnp.float32)
        out = jnp.maximum(
            jnp.dot(so, w(f"blk{i}_w2t0"), preferred_element_type=jnp.float32)
            + jnp.dot(out, w(f"blk{i}_w2t1"), preferred_element_type=jnp.float32)
            + w(f"blk{i}_b2"), 0.0)                                    # conv2+chomp+relu
        if has_ds:
            res = (jnp.dot(y, w(f"blk{i}_wd"), preferred_element_type=jnp.float32)
                   + w(f"blk{i}_bd"))
        else:
            res = y
        y = jnp.maximum(out + res, 0.0)                                # relu(out + res)

    # ---- decoder Linear -------------------------------------------------------------
    dec = jnp.dot(y, w("wdec"), preferred_element_type=jnp.float32) + w("bdec")
    o_ref[...] = dec.reshape(batch, seq, dec.shape[-1])


# ----------------------------------------------------------------------------------
# Host-side glue: shift matrices, weight-slab packing, pallas_call wrapper
# ----------------------------------------------------------------------------------
def _shift_matrix(batch, seq, dilation):
    # Rows are b-major (r = b*seq + t).  S_d[r, c] = 1 iff c == r - d and both rows
    # belong to the same batch element, so (S_d @ y)[b,t] = y[b, t-d] (0 for t < d).
    idx = jnp.arange(batch * seq)
    row, col = idx[:, None], idx[None, :]
    keep = (col == row - dilation) & ((row // seq) == (col // seq))
    return keep.astype(jnp.float32)


def _pack_slab(named):
    """Pack 2-D f32 arrays into one (rows, 128) slab; every array starts on an
    (8,128)-tile-aligned row offset so in-kernel static slices are cheap views."""
    entries, blocks, row = {}, [], 0
    for name, a in named:
        a = jnp.asarray(a, jnp.float32)
        r, c = a.shape
        assert c <= _LANE, (name, a.shape)
        rp = ((r + _SUB - 1) // _SUB) * _SUB
        blocks.append(jnp.zeros((rp, _LANE), jnp.float32).at[:r, :c].set(a))
        entries[name] = (row, r, c)
        row += rp
    return jnp.concatenate(blocks, axis=0), entries


def _assemble(params, batch, seq):
    a, r, l, d = params["attn"], params["rnn"], params["ln"], params["dec"]
    named = [("wqkv", a["wqkv"]), ("bqkv", a["bqkv"]), ("wo", a["wo"]), ("bo", a["bo"]),
             ("ln_a", a["ln_a"]), ("ln_b", a["ln_b"]),
             ("w_ih", r["w_ih"]), ("w_hh", r["w_hh"]), ("b_rnn", r["b"]),
             ("ln2_a", l["a"]), ("ln2_b", l["b"])]
    block_flags = []
    for i, blk in enumerate(params["tcn"]):
        has_ds = "wd" in blk
        block_flags.append(has_ds)
        named += [(f"blk{i}_shift", _shift_matrix(batch, seq, blk["dilation"])),
                  (f"blk{i}_w1t0", blk["w1_t0"]), (f"blk{i}_w1t1", blk["w1_t1"]),
                  (f"blk{i}_b1", blk["b1"]),
                  (f"blk{i}_w2t0", blk["w2_t0"]), (f"blk{i}_w2t1", blk["w2_t1"]),
                  (f"blk{i}_b2", blk["b2"])]
        if has_ds:
            named += [(f"blk{i}_wd", blk["wd"]), (f"blk{i}_bd", blk["bd"])]
    named += [("wdec", d["w"]), ("bdec", d["b"])]
    return named, tuple(block_flags)


def tcn_forward(x, params):
    batch, seq, feat = x.shape
    d_model = params["rnn"]["w_ih"].shape[1]
    out_size = params["dec"]["w"].shape[1]

    named, block_flags = _assemble(params, batch, seq)
    slab, entries = _pack_slab(named)

    kern = functools.partial(tcn_fused_kernel, entries=entries, block_flags=block_flags,
                             batch=batch, seq=seq, feat=feat, d_model=d_model)
    return pl.pallas_call(
        kern,
        out_shape=jax.ShapeDtypeStruct((batch, seq, out_size), jnp.float32),
        in_specs=[pl.BlockSpec(memory_space=pltpu.MemorySpace.VMEM),   # x   (whole array)
                  pl.BlockSpec(memory_space=pltpu.MemorySpace.VMEM)],  # weight slab
        out_specs=pl.BlockSpec(memory_space=pltpu.MemorySpace.VMEM),
    )(x, slab)


# ----------------------------------------------------------------------------------
# Deterministic parameter initialization (glue)
# ----------------------------------------------------------------------------------
def init_params(key, *, feat=16, d_model=32, num_channels=(16, 32),
                output_size=8, kernel_size=2):
    assert kernel_size == 2  # module default; kernel implements the 2-tap causal conv
    ks = iter(jax.random.split(key, 64))

    def nrm(shape, std=0.01):
        return std * jax.random.normal(next(ks), shape, dtype=jnp.float32)

    def uni(shape, bound):
        return jax.random.uniform(next(ks), shape, jnp.float32, -bound, bound)

    p = {}

    # SelfAttention(1 head, 16 -> 16); Q/K/V fused into one (F, 3F) weight/bias.
    bound = 1.0 / (feat ** 0.5)
    wq, wk, wv, wo = [uni((feat, feat), bound) for _ in range(4)]
    bq, bk, bv, bo = [uni((1, feat), bound) for _ in range(4)]
    p["attn"] = {"wqkv": jnp.concatenate([wq, wk, wv], axis=1),
                 "bqkv": jnp.concatenate([bq, bk, bv], axis=1),
                 "wo": wo, "bo": bo,
                 "ln_a": jnp.ones((1, feat), jnp.float32),
                 "ln_b": jnp.zeros((1, feat), jnp.float32)}

    # Time_Embeddings: nn.RNN(input=16, hidden=d_model, num_layers=1, batch_first)
    bound = 1.0 / (d_model ** 0.5)
    p["rnn"] = {"w_ih": uni((feat, d_model), bound),
                "w_hh": uni((d_model, d_model), bound),
                "b": uni((1, d_model), bound) + uni((1, d_model), bound)}   # b_ih + b_hh

    # custom LayerNorm(d_model): a_2 = ones, b_2 = zeros
    p["ln"] = {"a": jnp.ones((1, d_model), jnp.float32),
               "b": jnp.zeros((1, d_model), jnp.float32)}

    # TemporalConvNet: weight_norm Conv1d reparam (w = g * v / ||v||) folded here;
    # the two conv taps are kept as separate (Cin, Cout) matmul weights.
    def weight_norm_weight(cout, cin, k):
        v = nrm((cout, cin, k), 0.01)
        g = 1.0 + 0.1 * jax.random.normal(next(ks), (cout,), jnp.float32)
        norm = jnp.sqrt(jnp.sum(v * v, axis=(1, 2), keepdims=True))
        return g[:, None, None] * v / norm

    blocks = []
    in_c = d_model
    for i, out_c in enumerate(num_channels):
        dilation = 2 ** i
        w1 = weight_norm_weight(out_c, in_c, kernel_size)
        w2 = weight_norm_weight(out_c, out_c, kernel_size)
        blk = {"dilation": dilation,
               "w1_t0": jnp.transpose(w1[:, :, 0]), "w1_t1": jnp.transpose(w1[:, :, 1]),
               "b1": uni((1, out_c), 1.0 / ((in_c * kernel_size) ** 0.5)),
               "w2_t0": jnp.transpose(w2[:, :, 0]), "w2_t1": jnp.transpose(w2[:, :, 1]),
               "b2": uni((1, out_c), 1.0 / ((out_c * kernel_size) ** 0.5))}
        if in_c != out_c:                     # 1x1 downsample conv
            blk["wd"] = jnp.transpose(nrm((out_c, in_c, 1), 0.01)[:, :, 0])
            blk["bd"] = uni((1, out_c), 1.0 / (in_c ** 0.5))
        blocks.append(blk)
        in_c = out_c
    p["tcn"] = blocks

    # decoder: Linear(num_channels[-1], output_size); weight ~ N(0, 0.01), bias = 0
    p["dec"] = {"w": jnp.transpose(nrm((output_size, num_channels[-1]), 0.01)),
                "b": jnp.zeros((1, output_size), jnp.float32)}
    return p


# ----------------------------------------------------------------------------------
if __name__ == "__main__":
    B, S, FEAT = 2, 8, 16
    D_MODEL, NUM_CHANNELS, OUTPUT_SIZE = 32, (16, 32), 8

    key = jax.random.PRNGKey(0)
    k_x, k_p = jax.random.split(key)
    x = jax.random.normal(k_x, (B, S, FEAT), dtype=jnp.float32)
    params = init_params(k_p, feat=FEAT, d_model=D_MODEL,
                         num_channels=NUM_CHANNELS, output_size=OUTPUT_SIZE,
                         kernel_size=2)

    y = tcn_forward(x, params)
    y = jax.block_until_ready(y)
    assert y.shape == (B, S, OUTPUT_SIZE), y.shape
    assert y.dtype == jnp.float32
    assert bool(jnp.all(jnp.isfinite(y)))
    print("KERNEL_OK")
</pallas_src>

<mosaic_0001>
module attributes {stable_mosaic.version = 11 : i64} {
  func.func @tcn_fused_kernel(%arg0: memref<2x8x16xf32, #tpu.memory_space<vmem>>, %arg1: memref<496x128xf32, #tpu.memory_space<vmem>>, %arg2: memref<2x8x8xf32, #tpu.memory_space<vmem>>) attributes {dimension_semantics = [], scalar_prefetch = 0 : i64, scratch_operands = 0 : i64, tpu.core_type = #tpu.core_type<tc>} {
    %c0 = arith.constant 0 : index
    %c0_0 = arith.constant 0 : index
    %c0_1 = arith.constant 0 : index
    %0 = vector.load %arg0[%c0, %c0_0, %c0_1] : memref<2x8x16xf32, #tpu.memory_space<vmem>>, vector<2x8x16xf32>
    %1 = vector.shape_cast %0 : vector<2x8x16xf32> to vector<16x16xf32>
    %c0_2 = arith.constant 0 : index
    %c0_3 = arith.constant 0 : index
    %2 = vector.load %arg1[%c0_2, %c0_3] : memref<496x128xf32, #tpu.memory_space<vmem>>, vector<16x48xf32>
    %cst = arith.constant dense<0.000000e+00> : vector<16x48xf32>
    %3 = tpu.matmul %1, %2, %cst {dimension_numbers = #tpu.dot_dimension_numbers<[1], [0], [0], [1], [0, 0, 1, 1], [], []>} : vector<16x16xf32>, vector<16x48xf32>, vector<16x48xf32> -> vector<16x48xf32>
    %c16 = arith.constant 16 : index
    %c0_4 = arith.constant 0 : index
    %4 = vector.load %arg1[%c16, %c0_4] : memref<496x128xf32, #tpu.memory_space<vmem>>, vector<1x48xf32>
    %5 = vector.broadcast %4 : vector<1x48xf32> to vector<16x48xf32>
    %6 = arith.addf %3, %5 : vector<16x48xf32>
    %7 = vector.shape_cast %6 : vector<16x48xf32> to vector<2x8x48xf32>
    %8 = vector.extract_strided_slice %7 {offsets = [0, 0, 0], sizes = [2, 8, 16], strides = [1, 1, 1]} : vector<2x8x48xf32> to vector<2x8x16xf32>
    %9 = vector.extract_strided_slice %7 {offsets = [0, 0, 16], sizes = [2, 8, 16], strides = [1, 1, 1]} : vector<2x8x48xf32> to vector<2x8x16xf32>
    %10 = vector.extract_strided_slice %7 {offsets = [0, 0, 32], sizes = [2, 8, 16], strides = [1, 1, 1]} : vector<2x8x48xf32> to vector<2x8x16xf32>
    %cst_5 = arith.constant dense<0.000000e+00> : vector<2x8x8xf32>
    %11 = tpu.matmul %8, %9, %cst_5 {dimension_numbers = #tpu.dot_dimension_numbers<[2], [2], [1], [1], [0, 0, 0, 1, 1, 1], [0], [0]>} : vector<2x8x16xf32>, vector<2x8x16xf32>, vector<2x8x8xf32> -> vector<2x8x8xf32>
    %cst_6 = arith.constant 2.500000e-01 : f32
    %12 = vector.broadcast %cst_6 : f32 to vector<2x8x8xf32>
    %13 = arith.mulf %11, %12 : vector<2x8x8xf32>
    %cst_7 = arith.constant dense<0xFF800000> : vector<2x8xf32>
    %14 = vector.multi_reduction <maximumf>, %13, %cst_7 [2] : vector<2x8x8xf32> to vector<2x8xf32>
    %15 = vector.shape_cast %14 : vector<2x8xf32> to vector<2x8x1xf32>
    %16 = vector.broadcast %15 : vector<2x8x1xf32> to vector<2x8x8xf32>
    %17 = arith.subf %13, %16 : vector<2x8x8xf32>
    %18 = math.exp %17 : vector<2x8x8xf32>
    %cst_8 = arith.constant dense<0.000000e+00> : vector<2x8xf32>
    %19 = vector.multi_reduction <add>, %18, %cst_8 [2] : vector<2x8x8xf32> to vector<2x8xf32>
    %20 = vector.shape_cast %19 : vector<2x8xf32> to vector<2x8x1xf32>
    %21 = vector.broadcast %20 : vector<2x8x1xf32> to vector<2x8x8xf32>
    %22 = arith.divf %18, %21 : vector<2x8x8xf32>
    %cst_9 = arith.constant dense<0.000000e+00> : vector<2x8x16xf32>
    %23 = tpu.matmul %22, %10, %cst_9 {dimension_numbers = #tpu.dot_dimension_numbers<[2], [1], [1], [2], [0, 0, 0, 1, 1, 2], [0], [0]>} : vector<2x8x8xf32>, vector<2x8x16xf32>, vector<2x8x16xf32> -> vector<2x8x16xf32>
    %24 = vector.shape_cast %23 : vector<2x8x16xf32> to vector<16x16xf32>
    %c24 = arith.constant 24 : index
    %c0_10 = arith.constant 0 : index
    %25 = vector.load %arg1[%c24, %c0_10] : memref<496x128xf32, #tpu.memory_space<vmem>>, vector<16x16xf32>
    %cst_11 = arith.constant dense<0.000000e+00> : vector<16x16xf32>
    %26 = tpu.matmul %24, %25, %cst_11 {dimension_numbers = #tpu.dot_dimension_numbers<[1], [0], [0], [1], [0, 0, 1, 1], [], []>} : vector<16x16xf32>, vector<16x16xf32>, vector<16x16xf32> -> vector<16x16xf32>
    %c40 = arith.constant 40 : index
    %c0_12 = arith.constant 0 : index
    %27 = vector.load %arg1[%c40, %c0_12] : memref<496x128xf32, #tpu.memory_space<vmem>>, vector<1x16xf32>
    %28 = vector.broadcast %27 : vector<1x16xf32> to vector<16x16xf32>
    %29 = arith.addf %26, %28 : vector<16x16xf32>
    %30 = arith.addf %29, %1 : vector<16x16xf32>
    %c48 = arith.constant 48 : index
    %c0_13 = arith.constant 0 : index
    %31 = vector.load %arg1[%c48, %c0_13] : memref<496x128xf32, #tpu.memory_space<vmem>>, vector<1x16xf32>
    %c56 = arith.constant 56 : index
    %c0_14 = arith.constant 0 : index
    %32 = vector.load %arg1[%c56, %c0_14] : memref<496x128xf32, #tpu.memory_space<vmem>>, vector<1x16xf32>
    %cst_15 = arith.constant dense<0.000000e+00> : vector<16xf32>
    %33 = vector.multi_reduction <add>, %30, %cst_15 [1] : vector<16x16xf32> to vector<16xf32>
    %34 = vector.shape_cast %33 : vector<16xf32> to vector<16x1xf32>
    %cst_16 = arith.constant 1.600000e+01 : f32
    %35 = vector.broadcast %cst_16 : f32 to vector<16x1xf32>
    %36 = arith.divf %34, %35 : vector<16x1xf32>
    %37 = vector.broadcast %36 : vector<16x1xf32> to vector<16x16xf32>
    %38 = arith.subf %30, %37 : vector<16x16xf32>
    %39 = arith.mulf %38, %38 : vector<16x16xf32>
    %cst_17 = arith.constant dense<0.000000e+00> : vector<16xf32>
    %40 = vector.multi_reduction <add>, %39, %cst_17 [1] : vector<16x16xf32> to vector<16xf32>
    %41 = vector.shape_cast %40 : vector<16xf32> to vector<16x1xf32>
    %cst_18 = arith.constant 1.500000e+01 : f32
    %42 = vector.broadcast %cst_18 : f32 to vector<16x1xf32>
    %43 = arith.divf %41, %42 : vector<16x1xf32>
    %44 = vector.broadcast %36 : vector<16x1xf32> to vector<16x16xf32>
    %45 = arith.subf %30, %44 : vector<16x16xf32>
    %46 = vector.broadcast %31 : vector<1x16xf32> to vector<16x16xf32>
    %47 = arith.mulf %46, %45 : vector<16x16xf32>
    %48 = math.sqrt %43 : vector<16x1xf32>
    %cst_19 = arith.constant 9.99999997E-7 : f32
    %49 = vector.broadcast %cst_19 : f32 to vector<16x1xf32>
    %50 = arith.addf %48, %49 : vector<16x1xf32>
    %51 = vector.broadcast %50 : vector<16x1xf32> to vector<16x16xf32>
    %52 = arith.divf %47, %51 : vector<16x16xf32>
    %53 = vector.broadcast %32 : vector<1x16xf32> to vector<16x16xf32>
    %54 = arith.addf %52, %53 : vector<16x16xf32>
    %c64 = arith.constant 64 : index
    %c0_20 = arith.constant 0 : index
    %55 = vector.load %arg1[%c64, %c0_20] : memref<496x128xf32, #tpu.memory_space<vmem>>, vector<16x32xf32>
    %cst_21 = arith.constant dense<0.000000e+00> : vector<16x32xf32>
    %56 = tpu.matmul %54, %55, %cst_21 {dimension_numbers = #tpu.dot_dimension_numbers<[1], [0], [0], [1], [0, 0, 1, 1], [], []>} : vector<16x16xf32>, vector<16x32xf32>, vector<16x32xf32> -> vector<16x32xf32>
    %c112 = arith.constant 112 : index
    %c0_22 = arith.constant 0 : index
    %57 = vector.load %arg1[%c112, %c0_22] : memref<496x128xf32, #tpu.memory_space<vmem>>, vector<1x32xf32>
    %58 = vector.broadcast %57 : vector<1x32xf32> to vector<16x32xf32>
    %59 = arith.addf %56, %58 : vector<16x32xf32>
    %60 = vector.shape_cast %59 : vector<16x32xf32> to vector<2x8x32xf32>
    %c80 = arith.constant 80 : index
    %c0_23 = arith.constant 0 : index
    %61 = vector.load %arg1[%c80, %c0_23] : memref<496x128xf32, #tpu.memory_space<vmem>>, vector<32x32xf32>
    %62 = tpu.iota {dimensions = array<i32: 1>} : vector<2x8x32xi32>
    %cst_24 = arith.constant 0.000000e+00 : f32
    %63 = vector.broadcast %cst_24 : f32 to vector<2x32xf32>
    %cst_25 = arith.constant 0.000000e+00 : f32
    %64 = vector.broadcast %cst_25 : f32 to vector<2x8x32xf32>
    %65 = vector.extract_strided_slice %60 {offsets = [0, 0, 0], sizes = [2, 1, 32], strides = [1, 1, 1]} : vector<2x8x32xf32> to vector<2x1x32xf32>
    %66 = vector.shape_cast %65 : vector<2x1x32xf32> to vector<2x32xf32>
    %cst_26 = arith.constant dense<0.000000e+00> : vector<2x32xf32>
    %67 = tpu.matmul %63, %61, %cst_26 {dimension_numbers = #tpu.dot_dimension_numbers<[1], [0], [0], [1], [0, 0, 1, 1], [], []>} : vector<2x32xf32>, vector<32x32xf32>, vector<2x32xf32> -> vector<2x32xf32>
    %68 = arith.addf %66, %67 : vector<2x32xf32>
    %69 = math.tanh %68 : vector<2x32xf32>
    %c0_i32 = arith.constant 0 : i32
    %70 = vector.broadcast %c0_i32 : i32 to vector<2x8x32xi32>
    %71 = arith.cmpi eq, %62, %70 : vector<2x8x32xi32>
    %72 = vector.shape_cast %69 : vector<2x32xf32> to vector<2x1x32xf32>
    %cst_27 = arith.constant 0.000000e+00 : f32
    %73 = vector.shape_cast %72 : vector<2x1x32xf32> to vector<2x1x32xf32>
    %74 = vector.broadcast %73 : vector<2x1x32xf32> to vector<2x8x32xf32>
    %75 = vector.broadcast %cst_27 : f32 to vector<2x8x32xf32>
    %76 = arith.select %71, %74, %75 : vector<2x8x32xi1>, vector<2x8x32xf32>
    %77 = arith.addf %64, %76 : vector<2x8x32xf32>
    %78 = vector.extract_strided_slice %60 {offsets = [0, 1, 0], sizes = [2, 1, 32], strides = [1, 1, 1]} : vector<2x8x32xf32> to vector<2x1x32xf32>
    %79 = vector.shape_cast %78 : vector<2x1x32xf32> to vector<2x32xf32>
    %cst_28 = arith.constant dense<0.000000e+00> : vector<2x32xf32>
    %80 = tpu.matmul %69, %61, %cst_28 {dimension_numbers = #tpu.dot_dimension_numbers<[1], [0], [0], [1], [0, 0, 1, 1], [], []>} : vector<2x32xf32>, vector<32x32xf32>, vector<2x32xf32> -> vector<2x32xf32>
    %81 = arith.addf %79, %80 : vector<2x32xf32>
    %82 = math.tanh %81 : vector<2x32xf32>
    %c1_i32 = arith.constant 1 : i32
    %83 = vector.broadcast %c1_i32 : i32 to vector<2x8x32xi32>
    %84 = arith.cmpi eq, %62, %83 : vector<2x8x32xi32>
    %85 = vector.shape_cast %82 : vector<2x32xf32> to vector<2x1x32xf32>
    %cst_29 = arith.constant 0.000000e+00 : f32
    %86 = vector.shape_cast %85 : vector<2x1x32xf32> to vector<2x1x32xf32>
    %87 = vector.broadcast %86 : vector<2x1x32xf32> to vector<2x8x32xf32>
    %88 = vector.broadcast %cst_29 : f32 to vector<2x8x32xf32>
    %89 = arith.select %84, %87, %88 : vector<2x8x32xi1>, vector<2x8x32xf32>
    %90 = arith.addf %77, %89 : vector<2x8x32xf32>
    %91 = vector.extract_strided_slice %60 {offsets = [0, 2, 0], sizes = [2, 1, 32], strides = [1, 1, 1]} : vector<2x8x32xf32> to vector<2x1x32xf32>
    %92 = vector.shape_cast %91 : vector<2x1x32xf32> to vector<2x32xf32>
    %cst_30 = arith.constant dense<0.000000e+00> : vector<2x32xf32>
    %93 = tpu.matmul %82, %61, %cst_30 {dimension_numbers = #tpu.dot_dimension_numbers<[1], [0], [0], [1], [0, 0, 1, 1], [], []>} : vector<2x32xf32>, vector<32x32xf32>, vector<2x32xf32> -> vector<2x32xf32>
    %94 = arith.addf %92, %93 : vector<2x32xf32>
    %95 = math.tanh %94 : vector<2x32xf32>
    %c2_i32 = arith.constant 2 : i32
    %96 = vector.broadcast %c2_i32 : i32 to vector<2x8x32xi32>
    %97 = arith.cmpi eq, %62, %96 : vector<2x8x32xi32>
    %98 = vector.shape_cast %95 : vector<2x32xf32> to vector<2x1x32xf32>
    %cst_31 = arith.constant 0.000000e+00 : f32
    %99 = vector.shape_cast %98 : vector<2x1x32xf32> to vector<2x1x32xf32>
    %100 = vector.broadcast %99 : vector<2x1x32xf32> to vector<2x8x32xf32>
    %101 = vector.broadcast %cst_31 : f32 to vector<2x8x32xf32>
    %102 = arith.select %97, %100, %101 : vector<2x8x32xi1>, vector<2x8x32xf32>
    %103 = arith.addf %90, %102 : vector<2x8x32xf32>
    %104 = vector.extract_strided_slice %60 {offsets = [0, 3, 0], sizes = [2, 1, 32], strides = [1, 1, 1]} : vector<2x8x32xf32> to vector<2x1x32xf32>
    %105 = vector.shape_cast %104 : vector<2x1x32xf32> to vector<2x32xf32>
    %cst_32 = arith.constant dense<0.000000e+00> : vector<2x32xf32>
    %106 = tpu.matmul %95, %61, %cst_32 {dimension_numbers = #tpu.dot_dimension_numbers<[1], [0], [0], [1], [0, 0, 1, 1], [], []>} : vector<2x32xf32>, vector<32x32xf32>, vector<2x32xf32> -> vector<2x32xf32>
    %107 = arith.addf %105, %106 : vector<2x32xf32>
    %108 = math.tanh %107 : vector<2x32xf32>
    %c3_i32 = arith.constant 3 : i32
    %109 = vector.broadcast %c3_i32 : i32 to vector<2x8x32xi32>
    %110 = arith.cmpi eq, %62, %109 : vector<2x8x32xi32>
    %111 = vector.shape_cast %108 : vector<2x32xf32> to vector<2x1x32xf32>
    %cst_33 = arith.constant 0.000000e+00 : f32
    %112 = vector.shape_cast %111 : vector<2x1x32xf32> to vector<2x1x32xf32>
    %113 = vector.broadcast %112 : vector<2x1x32xf32> to vector<2x8x32xf32>
    %114 = vector.broadcast %cst_33 : f32 to vector<2x8x32xf32>
    %115 = arith.select %110, %113, %114 : vector<2x8x32xi1>, vector<2x8x32xf32>
    %116 = arith.addf %103, %115 : vector<2x8x32xf32>
    %117 = vector.extract_strided_slice %60 {offsets = [0, 4, 0], sizes = [2, 1, 32], strides = [1, 1, 1]} : vector<2x8x32xf32> to vector<2x1x32xf32>
    %118 = vector.shape_cast %117 : vector<2x1x32xf32> to vector<2x32xf32>
    %cst_34 = arith.constant dense<0.000000e+00> : vector<2x32xf32>
    %119 = tpu.matmul %108, %61, %cst_34 {dimension_numbers = #tpu.dot_dimension_numbers<[1], [0], [0], [1], [0, 0, 1, 1], [], []>} : vector<2x32xf32>, vector<32x32xf32>, vector<2x32xf32> -> vector<2x32xf32>
    %120 = arith.addf %118, %119 : vector<2x32xf32>
    %121 = math.tanh %120 : vector<2x32xf32>
    %c4_i32 = arith.constant 4 : i32
    %122 = vector.broadcast %c4_i32 : i32 to vector<2x8x32xi32>
    %123 = arith.cmpi eq, %62, %122 : vector<2x8x32xi32>
    %124 = vector.shape_cast %121 : vector<2x32xf32> to vector<2x1x32xf32>
    %cst_35 = arith.constant 0.000000e+00 : f32
    %125 = vector.shape_cast %124 : vector<2x1x32xf32> to vector<2x1x32xf32>
    %126 = vector.broadcast %125 : vector<2x1x32xf32> to vector<2x8x32xf32>
    %127 = vector.broadcast %cst_35 : f32 to vector<2x8x32xf32>
    %128 = arith.select %123, %126, %127 : vector<2x8x32xi1>, vector<2x8x32xf32>
    %129 = arith.addf %116, %128 : vector<2x8x32xf32>
    %130 = vector.extract_strided_slice %60 {offsets = [0, 5, 0], sizes = [2, 1, 32], strides = [1, 1, 1]} : vector<2x8x32xf32> to vector<2x1x32xf32>
    %131 = vector.shape_cast %130 : vector<2x1x32xf32> to vector<2x32xf32>
    %cst_36 = arith.constant dense<0.000000e+00> : vector<2x32xf32>
    %132 = tpu.matmul %121, %61, %cst_36 {dimension_numbers = #tpu.dot_dimension_numbers<[1], [0], [0], [1], [0, 0, 1, 1], [], []>} : vector<2x32xf32>, vector<32x32xf32>, vector<2x32xf32> -> vector<2x32xf32>
    %133 = arith.addf %131, %132 : vector<2x32xf32>
    %134 = math.tanh %133 : vector<2x32xf32>
    %c5_i32 = arith.constant 5 : i32
    %135 = vector.broadcast %c5_i32 : i32 to vector<2x8x32xi32>
    %136 = arith.cmpi eq, %62, %135 : vector<2x8x32xi32>
    %137 = vector.shape_cast %134 : vector<2x32xf32> to vector<2x1x32xf32>
    %cst_37 = arith.constant 0.000000e+00 : f32
    %138 = vector.shape_cast %137 : vector<2x1x32xf32> to vector<2x1x32xf32>
    %139 = vector.broadcast %138 : vector<2x1x32xf32> to vector<2x8x32xf32>
    %140 = vector.broadcast %cst_37 : f32 to vector<2x8x32xf32>
    %141 = arith.select %136, %139, %140 : vector<2x8x32xi1>, vector<2x8x32xf32>
    %142 = arith.addf %129, %141 : vector<2x8x32xf32>
    %143 = vector.extract_strided_slice %60 {offsets = [0, 6, 0], sizes = [2, 1, 32], strides = [1, 1, 1]} : vector<2x8x32xf32> to vector<2x1x32xf32>
    %144 = vector.shape_cast %143 : vector<2x1x32xf32> to vector<2x32xf32>
    %cst_38 = arith.constant dense<0.000000e+00> : vector<2x32xf32>
    %145 = tpu.matmul %134, %61, %cst_38 {dimension_numbers = #tpu.dot_dimension_numbers<[1], [0], [0], [1], [0, 0, 1, 1], [], []>} : vector<2x32xf32>, vector<32x32xf32>, vector<2x32xf32> -> vector<2x32xf32>
    %146 = arith.addf %144, %145 : vector<2x32xf32>
    %147 = math.tanh %146 : vector<2x32xf32>
    %c6_i32 = arith.constant 6 : i32
    %148 = vector.broadcast %c6_i32 : i32 to vector<2x8x32xi32>
    %149 = arith.cmpi eq, %62, %148 : vector<2x8x32xi32>
    %150 = vector.shape_cast %147 : vector<2x32xf32> to vector<2x1x32xf32>
    %cst_39 = arith.constant 0.000000e+00 : f32
    %151 = vector.shape_cast %150 : vector<2x1x32xf32> to vector<2x1x32xf32>
    %152 = vector.broadcast %151 : vector<2x1x32xf32> to vector<2x8x32xf32>
    %153 = vector.broadcast %cst_39 : f32 to vector<2x8x32xf32>
    %154 = arith.select %149, %152, %153 : vector<2x8x32xi1>, vector<2x8x32xf32>
    %155 = arith.addf %142, %154 : vector<2x8x32xf32>
    %156 = vector.extract_strided_slice %60 {offsets = [0, 7, 0], sizes = [2, 1, 32], strides = [1, 1, 1]} : vector<2x8x32xf32> to vector<2x1x32xf32>
    %157 = vector.shape_cast %156 : vector<2x1x32xf32> to vector<2x32xf32>
    %cst_40 = arith.constant dense<0.000000e+00> : vector<2x32xf32>
    %158 = tpu.matmul %147, %61, %cst_40 {dimension_numbers = #tpu.dot_dimension_numbers<[1], [0], [0], [1], [0, 0, 1, 1], [], []>} : vector<2x32xf32>, vector<32x32xf32>, vector<2x32xf32> -> vector<2x32xf32>
    %159 = arith.addf %157, %158 : vector<2x32xf32>
    %160 = math.tanh %159 : vector<2x32xf32>
    %c7_i32 = arith.constant 7 : i32
    %161 = vector.broadcast %c7_i32 : i32 to vector<2x8x32xi32>
    %162 = arith.cmpi eq, %62, %161 : vector<2x8x32xi32>
    %163 = vector.shape_cast %160 : vector<2x32xf32> to vector<2x1x32xf32>
    %cst_41 = arith.constant 0.000000e+00 : f32
    %164 = vector.shape_cast %163 : vector<2x1x32xf32> to vector<2x1x32xf32>
    %165 = vector.broadcast %164 : vector<2x1x32xf32> to vector<2x8x32xf32>
    %166 = vector.broadcast %cst_41 : f32 to vector<2x8x32xf32>
    %167 = arith.select %162, %165, %166 : vector<2x8x32xi1>, vector<2x8x32xf32>
    %168 = arith.addf %155, %167 : vector<2x8x32xf32>
    %169 = vector.shape_cast %168 : vector<2x8x32xf32> to vector<16x32xf32>
    %c120 = arith.constant 120 : index
    %c0_42 = arith.constant 0 : index
    %170 = vector.load %arg1[%c120, %c0_42] : memref<496x128xf32, #tpu.memory_space<vmem>>, vector<1x32xf32>
    %c128 = arith.constant 128 : index
    %c0_43 = arith.constant 0 : index
    %171 = vector.load %arg1[%c128, %c0_43] : memref<496x128xf32, #tpu.memory_space<vmem>>, vector<1x32xf32>
    %cst_44 = arith.constant dense<0.000000e+00> : vector<16xf32>
    %172 = vector.multi_reduction <add>, %169, %cst_44 [1] : vector<16x32xf32> to vector<16xf32>
    %173 = vector.shape_cast %172 : vector<16xf32> to vector<16x1xf32>
    %cst_45 = arith.constant 3.200000e+01 : f32
    %174 = vector.broadcast %cst_45 : f32 to vector<16x1xf32>
    %175 = arith.divf %173, %174 : vector<16x1xf32>
    %176 = vector.broadcast %175 : vector<16x1xf32> to vector<16x32xf32>
    %177 = arith.subf %169, %176 : vector<16x32xf32>
    %178 = arith.mulf %177, %177 : vector<16x32xf32>
    %cst_46 = arith.constant dense<0.000000e+00> : vector<16xf32>
    %179 = vector.multi_reduction <add>, %178, %cst_46 [1] : vector<16x32xf32> to vector<16xf32>
    %180 = vector.shape_cast %179 : vector<16xf32> to vector<16x1xf32>
    %cst_47 = arith.constant 3.100000e+01 : f32
    %181 = vector.broadcast %cst_47 : f32 to vector<16x1xf32>
    %182 = arith.divf %180, %181 : vector<16x1xf32>
    %183 = vector.broadcast %175 : vector<16x1xf32> to vector<16x32xf32>
    %184 = arith.subf %169, %183 : vector<16x32xf32>
    %185 = vector.broadcast %170 : vector<1x32xf32> to vector<16x32xf32>
    %186 = arith.mulf %185, %184 : vector<16x32xf32>
    %187 = math.sqrt %182 : vector<16x1xf32>
    %cst_48 = arith.constant 9.99999997E-7 : f32
    %188 = vector.broadcast %cst_48 : f32 to vector<16x1xf32>
    %189 = arith.addf %187, %188 : vector<16x1xf32>
    %190 = vector.broadcast %189 : vector<16x1xf32> to vector<16x32xf32>
    %191 = arith.divf %186, %190 : vector<16x32xf32>
    %192 = vector.broadcast %171 : vector<1x32xf32> to vector<16x32xf32>
    %193 = arith.addf %191, %192 : vector<16x32xf32>
    %c136 = arith.constant 136 : index
    %c0_49 = arith.constant 0 : index
    %194 = vector.load %arg1[%c136, %c0_49] : memref<496x128xf32, #tpu.memory_space<vmem>>, vector<16x16xf32>
    %cst_50 = arith.constant dense<0.000000e+00> : vector<16x32xf32>
    %195 = tpu.matmul %194, %193, %cst_50 {dimension_numbers = #tpu.dot_dimension_numbers<[1], [0], [0], [1], [0, 0, 1, 1], [], []>} : vector<16x16xf32>, vector<16x32xf32>, vector<16x32xf32> -> vector<16x32xf32>
    %c152 = arith.constant 152 : index
    %c0_51 = arith.constant 0 : index
    %196 = vector.load %arg1[%c152, %c0_51] : memref<496x128xf32, #tpu.memory_space<vmem>>, vector<32x16xf32>
    %cst_52 = arith.constant dense<0.000000e+00> : vector<16x16xf32>
    %197 = tpu.matmul %195, %196, %cst_52 {dimension_numbers = #tpu.dot_dimension_numbers<[1], [0], [0], [1], [0, 0, 1, 1], [], []>} : vector<16x32xf32>, vector<32x16xf32>, vector<16x16xf32> -> vector<16x16xf32>
    %c184 = arith.constant 184 : index
    %c0_53 = arith.constant 0 : index
    %198 = vector.load %arg1[%c184, %c0_53] : memref<496x128xf32, #tpu.memory_space<vmem>>, vector<32x16xf32>
    %cst_54 = arith.constant dense<0.000000e+00> : vector<16x16xf32>
    %199 = tpu.matmul %193, %198, %cst_54 {dimension_numbers = #tpu.dot_dimension_numbers<[1], [0], [0], [1], [0, 0, 1, 1], [], []>} : vector<16x32xf32>, vector<32x16xf32>, vector<16x16xf32> -> vector<16x16xf32>
    %200 = arith.addf %197, %199 : vector<16x16xf32>
    %c216 = arith.constant 216 : index
    %c0_55 = arith.constant 0 : index
    %201 = vector.load %arg1[%c216, %c0_55] : memref<496x128xf32, #tpu.memory_space<vmem>>, vector<1x16xf32>
    %202 = vector.broadcast %201 : vector<1x16xf32> to vector<16x16xf32>
    %203 = arith.addf %200, %202 : vector<16x16xf32>
    %cst_56 = arith.constant 0.000000e+00 : f32
    %204 = vector.broadcast %cst_56 : f32 to vector<16x16xf32>
    %205 = arith.maximumf %203, %204 : vector<16x16xf32>
    %cst_57 = arith.constant dense<0.000000e+00> : vector<16x16xf32>
    %206 = tpu.matmul %194, %205, %cst_57 {dimension_numbers = #tpu.dot_dimension_numbers<[1], [0], [0], [1], [0, 0, 1, 1], [], []>} : vector<16x16xf32>, vector<16x16xf32>, vector<16x16xf32> -> vector<16x16xf32>
    %c224 = arith.constant 224 : index
    %c0_58 = arith.constant 0 : index
    %207 = vector.load %arg1[%c224, %c0_58] : memref<496x128xf32, #tpu.memory_space<vmem>>, vector<16x16xf32>
    %cst_59 = arith.constant dense<0.000000e+00> : vector<16x16xf32>
    %208 = tpu.matmul %206, %207, %cst_59 {dimension_numbers = #tpu.dot_dimension_numbers<[1], [0], [0], [1], [0, 0, 1, 1], [], []>} : vector<16x16xf32>, vector<16x16xf32>, vector<16x16xf32> -> vector<16x16xf32>
    %c240 = arith.constant 240 : index
    %c0_60 = arith.constant 0 : index
    %209 = vector.load %arg1[%c240, %c0_60] : memref<496x128xf32, #tpu.memory_space<vmem>>, vector<16x16xf32>
    %cst_61 = arith.constant dense<0.000000e+00> : vector<16x16xf32>
    %210 = tpu.matmul %205, %209, %cst_61 {dimension_numbers = #tpu.dot_dimension_numbers<[1], [0], [0], [1], [0, 0, 1, 1], [], []>} : vector<16x16xf32>, vector<16x16xf32>, vector<16x16xf32> -> vector<16x16xf32>
    %211 = arith.addf %208, %210 : vector<16x16xf32>
    %c256 = arith.constant 256 : index
    %c0_62 = arith.constant 0 : index
    %212 = vector.load %arg1[%c256, %c0_62] : memref<496x128xf32, #tpu.memory_space<vmem>>, vector<1x16xf32>
    %213 = vector.broadcast %212 : vector<1x16xf32> to vector<16x16xf32>
    %214 = arith.addf %211, %213 : vector<16x16xf32>
    %cst_63 = arith.constant 0.000000e+00 : f32
    %215 = vector.broadcast %cst_63 : f32 to vector<16x16xf32>
    %216 = arith.maximumf %214, %215 : vector<16x16xf32>
    %c264 = arith.constant 264 : index
    %c0_64 = arith.constant 0 : index
    %217 = vector.load %arg1[%c264, %c0_64] : memref<496x128xf32, #tpu.memory_space<vmem>>, vector<32x16xf32>
    %cst_65 = arith.constant dense<0.000000e+00> : vector<16x16xf32>
    %218 = tpu.matmul %193, %217, %cst_65 {dimension_numbers = #tpu.dot_dimension_numbers<[1], [0], [0], [1], [0, 0, 1, 1], [], []>} : vector<16x32xf32>, vector<32x16xf32>, vector<16x16xf32> -> vector<16x16xf32>
    %c296 = arith.constant 296 : index
    %c0_66 = arith.constant 0 : index
    %219 = vector.load %arg1[%c296, %c0_66] : memref<496x128xf32, #tpu.memory_space<vmem>>, vector<1x16xf32>
    %220 = vector.broadcast %219 : vector<1x16xf32> to vector<16x16xf32>
    %221 = arith.addf %218, %220 : vector<16x16xf32>
    %222 = arith.addf %216, %221 : vector<16x16xf32>
    %cst_67 = arith.constant 0.000000e+00 : f32
    %223 = vector.broadcast %cst_67 : f32 to vector<16x16xf32>
    %224 = arith.maximumf %222, %223 : vector<16x16xf32>
    %c304 = arith.constant 304 : index
    %c0_68 = arith.constant 0 : index
    %225 = vector.load %arg1[%c304, %c0_68] : memref<496x128xf32, #tpu.memory_space<vmem>>, vector<16x16xf32>
    %cst_69 = arith.constant dense<0.000000e+00> : vector<16x16xf32>
    %226 = tpu.matmul %225, %224, %cst_69 {dimension_numbers = #tpu.dot_dimension_numbers<[1], [0], [0], [1], [0, 0, 1, 1], [], []>} : vector<16x16xf32>, vector<16x16xf32>, vector<16x16xf32> -> vector<16x16xf32>
    %c320 = arith.constant 320 : index
    %c0_70 = arith.constant 0 : index
    %227 = vector.load %arg1[%c320, %c0_70] : memref<496x128xf32, #tpu.memory_space<vmem>>, vector<16x32xf32>
    %cst_71 = arith.constant dense<0.000000e+00> : vector<16x32xf32>
    %228 = tpu.matmul %226, %227, %cst_71 {dimension_numbers = #tpu.dot_dimension_numbers<[1], [0], [0], [1], [0, 0, 1, 1], [], []>} : vector<16x16xf32>, vector<16x32xf32>, vector<16x32xf32> -> vector<16x32xf32>
    %c336 = arith.constant 336 : index
    %c0_72 = arith.constant 0 : index
    %229 = vector.load %arg1[%c336, %c0_72] : memref<496x128xf32, #tpu.memory_space<vmem>>, vector<16x32xf32>
    %cst_73 = arith.constant dense<0.000000e+00> : vector<16x32xf32>
    %230 = tpu.matmul %224, %229, %cst_73 {dimension_numbers = #tpu.dot_dimension_numbers<[1], [0], [0], [1], [0, 0, 1, 1], [], []>} : vector<16x16xf32>, vector<16x32xf32>, vector<16x32xf32> -> vector<16x32xf32>
    %231 = arith.addf %228, %230 : vector<16x32xf32>
    %c352 = arith.constant 352 : index
    %c0_74 = arith.constant 0 : index
    %232 = vector.load %arg1[%c352, %c0_74] : memref<496x128xf32, #tpu.memory_space<vmem>>, vector<1x32xf32>
    %233 = vector.broadcast %232 : vector<1x32xf32> to vector<16x32xf32>
    %234 = arith.addf %231, %233 : vector<16x32xf32>
    %cst_75 = arith.constant 0.000000e+00 : f32
    %235 = vector.broadcast %cst_75 : f32 to vector<16x32xf32>
    %236 = arith.maximumf %234, %235 : vector<16x32xf32>
    %cst_76 = arith.constant dense<0.000000e+00> : vector<16x32xf32>
    %237 = tpu.matmul %225, %236, %cst_76 {dimension_numbers = #tpu.dot_dimension_numbers<[1], [0], [0], [1], [0, 0, 1, 1], [], []>} : vector<16x16xf32>, vector<16x32xf32>, vector<16x32xf32> -> vector<16x32xf32>
    %c360 = arith.constant 360 : index
    %c0_77 = arith.constant 0 : index
    %238 = vector.load %arg1[%c360, %c0_77] : memref<496x128xf32, #tpu.memory_space<vmem>>, vector<32x32xf32>
    %cst_78 = arith.constant dense<0.000000e+00> : vector<16x32xf32>
    %239 = tpu.matmul %237, %238, %cst_78 {dimension_numbers = #tpu.dot_dimension_numbers<[1], [0], [0], [1], [0, 0, 1, 1], [], []>} : vector<16x32xf32>, vector<32x32xf32>, vector<16x32xf32> -> vector<16x32xf32>
    %c392 = arith.constant 392 : index
    %c0_79 = arith.constant 0 : index
    %240 = vector.load %arg1[%c392, %c0_79] : memref<496x128xf32, #tpu.memory_space<vmem>>, vector<32x32xf32>
    %cst_80 = arith.constant dense<0.000000e+00> : vector<16x32xf32>
    %241 = tpu.matmul %236, %240, %cst_80 {dimension_numbers = #tpu.dot_dimension_numbers<[1], [0], [0], [1], [0, 0, 1, 1], [], []>} : vector<16x32xf32>, vector<32x32xf32>, vector<16x32xf32> -> vector<16x32xf32>
    %242 = arith.addf %239, %241 : vector<16x32xf32>
    %c424 = arith.constant 424 : index
    %c0_81 = arith.constant 0 : index
    %243 = vector.load %arg1[%c424, %c0_81] : memref<496x128xf32, #tpu.memory_space<vmem>>, vector<1x32xf32>
    %244 = vector.broadcast %243 : vector<1x32xf32> to vector<16x32xf32>
    %245 = arith.addf %242, %244 : vector<16x32xf32>
    %cst_82 = arith.constant 0.000000e+00 : f32
    %246 = vector.broadcast %cst_82 : f32 to vector<16x32xf32>
    %247 = arith.maximumf %245, %246 : vector<16x32xf32>
    %c432 = arith.constant 432 : index
    %c0_83 = arith.constant 0 : index
    %248 = vector.load %arg1[%c432, %c0_83] : memref<496x128xf32, #tpu.memory_space<vmem>>, vector<16x32xf32>
    %cst_84 = arith.constant dense<0.000000e+00> : vector<16x32xf32>
    %249 = tpu.matmul %224, %248, %cst_84 {dimension_numbers = #tpu.dot_dimension_numbers<[1], [0], [0], [1], [0, 0, 1, 1], [], []>} : vector<16x16xf32>, vector<16x32xf32>, vector<16x32xf32> -> vector<16x32xf32>
    %c448 = arith.constant 448 : index
    %c0_85 = arith.constant 0 : index
    %250 = vector.load %arg1[%c448, %c0_85] : memref<496x128xf32, #tpu.memory_space<vmem>>, vector<1x32xf32>
    %251 = vector.broadcast %250 : vector<1x32xf32> to vector<16x32xf32>
    %252 = arith.addf %249, %251 : vector<16x32xf32>
    %253 = arith.addf %247, %252 : vector<16x32xf32>
    %cst_86 = arith.constant 0.000000e+00 : f32
    %254 = vector.broadcast %cst_86 : f32 to vector<16x32xf32>
    %255 = arith.maximumf %253, %254 : vector<16x32xf32>
    %c456 = arith.constant 456 : index
    %c0_87 = arith.constant 0 : index
    %256 = vector.load %arg1[%c456, %c0_87] : memref<496x128xf32, #tpu.memory_space<vmem>>, vector<32x8xf32>
    %cst_88 = arith.constant dense<0.000000e+00> : vector<16x8xf32>
    %257 = tpu.matmul %255, %256, %cst_88 {dimension_numbers = #tpu.dot_dimension_numbers<[1], [0], [0], [1], [0, 0, 1, 1], [], []>} : vector<16x32xf32>, vector<32x8xf32>, vector<16x8xf32> -> vector<16x8xf32>
    %c488 = arith.constant 488 : index
    %c0_89 = arith.constant 0 : index
    %258 = vector.load %arg1[%c488, %c0_89] : memref<496x128xf32, #tpu.memory_space<vmem>>, vector<1x8xf32>
    %259 = vector.broadcast %258 : vector<1x8xf32> to vector<16x8xf32>
    %260 = arith.addf %257, %259 : vector<16x8xf32>
    %261 = vector.shape_cast %260 : vector<16x8xf32> to vector<2x8x8xf32>
    %c0_90 = arith.constant 0 : index
    %c0_91 = arith.constant 0 : index
    %c0_92 = arith.constant 0 : index
    %262 = vector.load %arg2[%c0_90, %c0_91, %c0_92] : memref<2x8x8xf32, #tpu.memory_space<vmem>>, vector<2x8x8xf32>
    tpu.vector_store %arg2[%c0_90, %c0_91, %c0_92], %261 {strides = array<i32>} : memref<2x8x8xf32, #tpu.memory_space<vmem>>, vector<2x8x8xf32>,
    return
  }
}

</mosaic_0001>

<bundles_post_ra>
// kernel: tpu_custom_call.1
= control target key start
LH: loop header
LB: loop body
LE: loop exit
PB: predicated region body
PF: predicated region fallthrough
CT: control target
= control target key end

     0   :  { %7 = vsyncpa [#allocation3], 0  ;;  %s3712_s0 = inlined_call_operand.hbm [shape: f32[2,8,16], index: 0, kind: input, shape index: {}]   ;;  %s3713_s1 = inlined_call_operand.hbm [shape: f32[496,128], index: 1, kind: input, shape index: {}]   ;;  %s3714_s2 = inlined_call_operand.hbm [shape: f32[2,8,8], index: 2, kind: output, shape index: {}]  }
   0x1   :  { %8 = vsyncpa [#allocation6], 0 }
   0x2   :  { %9 = vsyncpa [#allocation4], 0  ;;  %s3436_s9 = smov [#allocation2]  }
   0x3   :  { %s15_s10 = sshll.u32 %s3436_s9, 4  ;;  %s16_s10 = int_to_ptr.vmem [resolvable:$true] %s15_s10 }
   0x4   :  { %s3378_s11 = scalar_lea.vmem %s16_s10, 256  ;;  %p3383_p1 = scmp.lt.s32.totalorder %s16_s10, %s16_s10 }
   0x5   :  { %p3379_p0 = scmp.ne.s32.totalorder %s16_s10, %s3378_s11  ;;  %p3384_p2 = scmp.lt.s32.totalorder %s3378_s11, %s3378_s11 }
   0x7   :  { %p3385_p3 = por %p3384_p2, %p3383_p1 }
   0x9   :  { %p3386_p4 = pnand %p3385_p3, %p3379_p0 }
   0xb   :  { %3389 = shalt.err (!%p3386_p4)
}
   0xc   :  { %s3437_s12 = smov 128   ;;  %s3438_s13 = smov 8  }
   0xd   :  { %21 = dma.hbm_to_vmem [thread:$0]  %s3712_s0, 256, %s16_s10, [#allocation3], %s3437_s12, %s3437_s12, %s3438_s13  }
   0xe   :  { %s3439_s16 = smov [#allocation5]  }
   0xf   :  { %s27_s17 = sshll.u32 %s3439_s16, 4  ;;  %s28_s17 = int_to_ptr.vmem [resolvable:$true] %s27_s17 }
  0x10   :  { %s3398_s18 = scalar_lea.vmem %s28_s17, 7936  ;;  %p3403_p6 = scmp.lt.s32.totalorder %s28_s17, %s28_s17 }
  0x11   :  { %p3399_p5 = scmp.ne.s32.totalorder %s28_s17, %s3398_s18  ;;  %p3404_p7 = scmp.lt.s32.totalorder %s3398_s18, %s3398_s18 }
  0x13   :  { %p3405_p8 = por %p3404_p7, %p3403_p6 }
  0x15   :  { %p3406_p9 = pnand %p3405_p8, %p3399_p5 }
  0x17   :  { %3409 = shalt.err (!%p3406_p9)
}
  0x18   :  { %33 = dma.hbm_to_vmem [thread:$0]  %s3713_s1, 7936, %s28_s17, [#allocation6], %s3437_s12, %s3437_s12, %s3438_s13  }
  0x19   :  { %3430 = dma.done.wait [#allocation3], 256  }
  0x1a   :  { %3431 = vsyncadd [#allocation3], 4294967040 }
  0x1b   :  { %3432 = dma.done.wait [#allocation6], 7936  }
  0x1c   :  { %3433 = vsyncadd [#allocation6], 4294959360  ;;  %vm49_vm0 = vcmask 130048   ;;  %v43_v0 = vld [vmem:[#allocation5 + $0x8] sm:$0xff]  ;;  %v42_v1 = vld [vmem:[#allocation5] sm:$0xff]  ;;  %v3440_v4 = vmov 0.0  }
  0x1d   :  { %v3472_v2 = vld [vmem:[#allocation2] sm:$0xff]  ;;  %3047 = vmatprep.subr.mxu1 %v43_v0  ;;  %v3476_v3 = vld [vmem:[#allocation2 + $0x8] sm:$0xff]  ;;  %3059 = vmatprep.subr.mxu0 %v3440_v4  ;;  %vm3441_vm1 = vmmov 0   ;;  %s3442_s0 = smov 112   ;;  %vm287_vm2 = vcmask 64512   ;;  %s3443_s1 = smov 96  }
  0x1e   :  { %3051 = vmatprep.mubr.msk.f32.mxu1 %vm49_vm0, %v3472_v2  ;;  %3048 = vmatpush3.msra.mxu1 %v43_v0  ;;  %v2852_v6 = vld [vmem:[#allocation5 + $0x10] ss:$0 sm:$0xff]  ;;  %v463_v38 = vld [vmem:[#allocation5 + $0x20] sm:$0xff]  ;;  %v462_v39 = vld [vmem:[#allocation5 + $0x18] sm:$0xff]  ;;  %vm800_vm7 = vcmask 1041409   ;;  %vm702_vm8 = vcmask 261120  }
  0x1f   :  { %3049 = vmatprep.subr.mxu1 %v42_v1  ;;  %3061 = vmatprep.mubr.msk.f32.mxu0 %vm3441_vm1, %v3440_v4  ;;  %v2861_v44 = vld [vmem:[#allocation5 + $0x28] ss:$0 sm:$0xff]  ;;  %v3519_v0 = vld [vmem:[#allocation5 + $0x60] sm:$0xff]  ;;  %s3444_s21 = smov [#allocation7]  }
  0x20   :  { %3050 = vmatpush3.msra.mxu1 %v42_v1  ;;  %v3517_v63 = vld [vmem:[#allocation5 + $0x68] sm:$0xff]  ;;  %s2839_s22 = sshll.u32 %s3444_s21, 4  ;;  %s2840_s22 = int_to_ptr.vmem [resolvable:$true] %s2839_s22 }
  0x21   :  { %3052 = vmatmul.mubr.msk.f32.vlgmr.msra.gmra.mxu1 %vm49_vm0, %v3476_v3  ;;  %3054 = vmatprep.subr.mxu1 %v3440_v4  ;;  %v609_v1 = vld [vmem:[#allocation5 + $0x48] sm:$0xff]  ;;  %s3410_s23 = scalar_lea.vmem %s2840_s22, 256  ;;  %p3415_p11 = scmp.lt.s32.totalorder %s2840_s22, %s2840_s22 }
  0x22   :  { %3056 = vmatprep.mubr.msk.f32.mxu1 %vm3441_vm1, %v3440_v4  ;;  %p3411_p10 = scmp.ne.s32.totalorder %s2840_s22, %s3410_s23  ;;  %p3416_p12 = scmp.lt.s32.totalorder %s3410_s23, %s3410_s23 }
  0x24   :  { %p3417_p13 = por %p3416_p12, %p3415_p11 }
  0x26   :  { %p3418_p0 = pnand %p3417_p13, %p3411_p10 }
  0xe1   :  { %v3053_v5 = vpop.f32.mrf.mxu1 }
  0xe2   :  { %v128_v9 = vadd.f32 %v3053_v5, %v2852_v6  ;;  %v608_v5 = vld [vmem:[#allocation5 + $0x40] sm:$0xff] }
  0xe3   :  { %v122_v7 = vpop.f32.mrf.mxu1 }
  0xe4   :  { %v123_v8 = vadd.f32 %v2852_v6, %v122_v7 }
  0xe6   :  { %132 = vrot.lane.b32.xlu0 %v123_v8, %s3442_s0 }
  0xea   :  { %209 = vrot.lane.b32.xlu0 %v128_v9, %s3442_s0 }
 0x158   :  { %v133_v10 = vpop.permute.xlu0 %132 }
 0x159   :  { %3055 = vmatpush3.xpose.msk.msra.mxu1 %vm49_vm0, %v133_v10 }
 0x15a   :  { %3064 = vmatprep.subr.mxu1 %v3440_v4 }
 0x15c   :  { %3057 = vmatmul.mubr.msk.f32.vlgmr.msra.gmra.mxu1 %vm49_vm0, %v123_v8  ;;  %v210_v11 = vpop.permute.xlu0 %209 }
 0x15d   :  { %3060 = vmatpush3.xpose.msk.msra.mxu0 %vm49_vm0, %v210_v11  ;;  %3066 = vmatprep.mubr.msk.f32.mxu1 %vm3441_vm1, %v3440_v4 }
 0x15e   :  { %3069 = vmatprep.subr.mxu0 %v3440_v4 }
 0x160   :  { %3062 = vmatmul.mubr.msk.f32.vlgmr.msra.gmra.mxu0 %vm49_vm0, %v128_v9 }
 0x161   :  { %3071 = vmatprep.mubr.msk.f32.mxu0 %vm3441_vm1, %v3440_v4 }
 0x21c   :  { %v204_v12 = vpop.f32.mrf.mxu1 }
 0x21d   :  { %v285_v13 = vmul.f32 0.25, %v204_v12 }
 0x21e   :  { %v3058_v14 = vpop.f32.mrf.mxu1 }
 0x21f   :  { %v288_v15 = vsel %vm287_vm2, %v285_v13, -inf }
 0x220   :  { %289 = vmax.xlane.f32.xlu1 %v288_v15  ;;  %v281_v16 = vpop.f32.mrf.mxu0 }
 0x221   :  { %v286_v17 = vmul.f32 0.25, %v281_v16 }
 0x222   :  { %v3063_v18 = vpop.f32.mrf.mxu0 }
 0x223   :  { %v291_v19 = vsel %vm287_vm2, %v286_v17, -inf }
 0x224   :  { %292 = vmax.xlane.f32.xlu1 %v291_v19 }
 0x2a9   :  { %v290_v20 = vpop.xlane.xlu1 %289 }
 0x2aa   :  { %v294_v21 = vsub.f32 %v285_v13, %v290_v20 }
 0x2ac   :  { %v296_v22 = vmul.f32 1.442695, %v294_v21 }
 0x2ad   :  { %v293_v23 = vpop.xlane.xlu1 %292 }
 0x2ae   :  { %3314 = vpow2.f32 %v296_v22  ;;  %v295_v24 = vsub.f32 %v286_v17, %v293_v23  ;;  %v2864_v22 = vld [vmem:[#allocation5 + $0x30] ss:$0 sm:$0xff] }
 0x2b0   :  { %v298_v25 = vmul.f32 1.442695, %v295_v24 }
 0x2b2   :  { %3316 = vpow2.f32 %v298_v25  ;;  %v2865_v25 = vld [vmem:[#allocation5 + $0x38] ss:$0 sm:$0xff] }
 0x2bb   :  { %v3315_v26 = vpop.eup %3314 }
 0x2bc   :  { %v300_v27 = vsel %vm287_vm2, %v3315_v26, 0.0 }
 0x2bd   :  { %301 = vadd.xlane.f32.xlu0 %v300_v27 }
 0x2bf   :  { %v3317_v28 = vpop.eup %3316 }
 0x2c0   :  { %v303_v29 = vsel %vm287_vm2, %v3317_v28, 0.0 }
 0x2c1   :  { %304 = vadd.xlane.f32.xlu1 %v303_v29 }
 0x2d2   :  { %310 = vrot.lane.b32.xlu1 %v123_v8, %s3443_s1 }
 0x2d6   :  { %386 = vrot.lane.b32.xlu1 %v128_v9, %s3443_s1 }
 0x346   :  { %v302_v30 = vpop.xlane.xlu0 %301 }
 0x347   :  { %3318 = vrcp.f32 %v302_v30 }
 0x34a   :  { %v305_v31 = vpop.xlane.xlu1 %304 }
 0x34b   :  { %3320 = vrcp.f32 %v305_v31 }
 0x34e   :  { %v311_v32 = vpop.permute.xlu1 %310 }
 0x34f   :  { %3065 = vmatpush3.msra.mxu1 %v311_v32 }
 0x350   :  { %3074 = vmatprep.subr.mxu1 %v463_v38 }
 0x352   :  { %v387_v33 = vpop.permute.xlu1 %386 }
 0x353   :  { %3070 = vmatpush3.msra.mxu0 %v387_v33 }
 0x354   :  { %v3319_v34 = vpop.eup %3318  ;;  %3081 = vmatprep.subr.mxu0 %v609_v1 }
 0x355   :  { %v307_v35 = vmul.f32 %v3319_v34, %v3315_v26  ;;  %v2866_v34 = vld [vmem:[#allocation5 + $0x70] ss:$0 sm:$0xff] }
 0x357   :  { %3067 = vmatmul.mubr.msk.f32.vlgmr.msra.gmra.mxu1 %vm287_vm2, %v307_v35 }
 0x358   :  { %v3321_v36 = vpop.eup %3320  ;;  %3075 = vmatpush3.msra.mxu1 %v463_v38 }
 0x359   :  { %v309_v37 = vmul.f32 %v3321_v36, %v3317_v28  ;;  %3076 = vmatprep.subr.mxu1 %v462_v39 }
 0x35a   :  { %3077 = vmatpush3.msra.mxu1 %v462_v39 }
 0x35b   :  { %3072 = vmatmul.mubr.msk.f32.vlgmr.msra.gmra.mxu0 %vm287_vm2, %v309_v37  ;;  %3088 = vmatprep.subr.mxu1 %v3440_v4 }
 0x35c   :  { %3082 = vmatpush3.msra.mxu0 %v609_v1 }
 0x35d   :  { %3083 = vmatprep.subr.mxu0 %v608_v5 }
 0x35e   :  { %3084 = vmatpush3.msra.mxu0 %v608_v5 }
 0x35f   :  { %3099 = vmatprep.subr.mxu0 %v3440_v4 }
 0x417   :  { %v382_v40 = vpop.f32.mrf.mxu1 }
 0x418   :  { %3078 = vmatprep.mubr.msk.f32.mxu1 %vm49_vm0, %v382_v40 }
 0x419   :  { %v3068_v41 = vpop.f32.mrf.mxu1 }
 0x41b   :  { %v458_v42 = vpop.f32.mrf.mxu0 }
 0x41c   :  { %3079 = vmatmul.mubr.msk.f32.vlgmr.msra.gmra.mxu1 %vm49_vm0, %v458_v42 }
 0x41d   :  { %v3073_v43 = vpop.f32.mrf.mxu0  ;;  %3096 = vmatprep.mubr.msk.f32.mxu1 %vm3441_vm1, %v3440_v4  ;;  %3089 = vmatpush3.msra.mxu1 %v3517_v63 }
 0x41e   :  { %3090 = vmatprep.subr.mxu1 %v3440_v4 }
 0x41f   :  { %3091 = vmatpush3.msra.mxu1 %v3519_v0 }
 0x420   :  { %3092 = vmatprep.subr.mxu1 %v3440_v4 }
 0x4dc   :  { %v3080_v45 = vpop.f32.mrf.mxu1 }
 0x4dd   :  { %v547_v46 = vadd.f32 %v3080_v45, %v2861_v44 }
 0x4de   :  { %v541_v47 = vpop.f32.mrf.mxu1 }
 0x4df   :  { %v542_v48 = vadd.f32 %v2861_v44, %v541_v47  ;;  %v551_v49 = vadd.f32 %v547_v46, %v3476_v3  ;;  %v3529_v3 = vld [vmem:[#allocation5 + $0x50] sm:$0xff] }
 0x4e1   :  { %v557_v50 = vsel %vm49_vm0, %v551_v49, 0.0  ;;  %v550_v51 = vadd.f32 %v542_v48, %v3472_v2  ;;  %v3523_v2 = vld [vmem:[#allocation5 + $0x58] sm:$0xff] }
 0x4e2   :  { %558 = vadd.xlane.f32.xlu0 %v557_v50  ;;  %3093 = vmatpush3.msra.mxu1 %v3523_v2  ;;  %v700_v50 = vlaneseq }
 0x4e3   :  { %v554_v52 = vsel %vm49_vm0, %v550_v51, 0.0  ;;  %3094 = vmatprep.subr.mxu1 %v3440_v4 }
 0x4e4   :  { %555 = vadd.xlane.f32.xlu1 %v554_v52  ;;  %3095 = vmatpush3.msra.mxu1 %v3529_v3  ;;  %v3578_v52 = vshrl.u32 %v700_v50, 7 }
 0x4e5   :  { %3097 = vmatmul.mubr.f32.vlgmr.msra.gmra.mxu1 %v3440_v4  ;;  %3110 = vmatprep.subr.mxu1 %v3440_v4 }
 0x4e6   :  { %3111 = vmatpush3.msra.mxu1 %v3517_v63  ;;  %3118 = vmatprep.mubr.msk.f32.mxu1 %vm3441_vm1, %v3440_v4  ;;  %vm784_vm9 = vcmp.eq.s32.totalorder %v3578_v52, 0  ;;  %vm882_vm10 = vcmp.eq.s32.totalorder %v3578_v52, 1  ;;  %vm980_vm11 = vcmp.eq.s32.totalorder %v3578_v52, 2  ;;  %vm1079_vm12 = vcmp.eq.s32.totalorder %v3578_v52, 3 }
 0x4e7   :  { %3112 = vmatprep.subr.mxu1 %v3440_v4  ;;  %vm1178_vm13 = vcmp.eq.s32.totalorder %v3578_v52, 4  ;;  %vm1277_vm14 = vcmp.eq.s32.totalorder %v3578_v52, 5  ;;  %vm1376_vm15 = vcmp.eq.s32.totalorder %v3578_v52, 6 }
 0x4e8   :  { %3113 = vmatpush3.msra.mxu1 %v3519_v0 }
 0x4e9   :  { %3114 = vmatprep.subr.mxu1 %v3440_v4 }
 0x4ea   :  { %3115 = vmatpush3.msra.mxu1 %v3523_v2 }
 0x4eb   :  { %3116 = vmatprep.subr.mxu1 %v3440_v4 }
 0x4ec   :  { %3117 = vmatpush3.msra.mxu1 %v3529_v3 }
 0x4ed   :  { %3132 = vmatprep.subr.mxu1 %v3440_v4 }
 0x56b   :  { %v559_v53 = vpop.xlane.xlu0 %558 }
 0x56c   :  { %v562_v54 = vmul.f32 0.0625, %v559_v53  ;;  %v787_v53 = vsub.s32 0, %v3578_v52 }
 0x56d   :  { %v556_v55 = vpop.xlane.xlu1 %555 }
 0x56e   :  { %v561_v56 = vmul.f32 0.0625, %v556_v55  ;;  %v3511_v57 = vsub.f32 %v551_v49, %v562_v54  ;;  %v885_v54 = vsub.s32 1, %v3578_v52 }
 0x570   :  { %v563_v58 = vsub.f32 %v550_v51, %v561_v56  ;;  %v566_v61 = vmul.f32 %v3511_v57, %v3511_v57  ;;  %v581_v27 = vmul.f32 %v2864_v22, %v3511_v57 }
 0x572   :  { %v565_v59 = vmul.f32 %v563_v58, %v563_v58  ;;  %v570_v62 = vsel %vm49_vm0, %v566_v61, 0.0  ;;  %v580_v23 = vmul.f32 %v2864_v22, %v563_v58 }
 0x574   :  { %v567_v60 = vsel %vm49_vm0, %v565_v59, 0.0 }
 0x575   :  { %568 = vadd.xlane.f32.xlu0 %v567_v60 }
 0x579   :  { %571 = vadd.xlane.f32.xlu0 %v570_v62 }
 0x5a5   :  { %v772_v32 = vpop.f32.mrf.mxu1 }
 0x5a6   :  { %v777_v35 = vrot.slane %v772_v32, 1 }
 0x5a7   :  { %v3098_v33 = vpop.f32.mrf.mxu1 }
 0x5fe   :  { %v569_v6 = vpop.xlane.xlu0 %568 }
 0x5ff   :  { %v574_v7 = vmul.f32 0.06666667, %v569_v6 }
 0x601   :  { %3322 = vrsqrt.f32 %v574_v7  ;;  %vm584_vm3 = vcmp.eq.f32.partialorder %v574_v7, inf  ;;  %v587_v12 = vand.u32 2147483648, %v574_v7  ;;  %vm586_vm4 = vcmp.eq.f32.partialorder %v574_v7, 0.0 }
 0x602   :  { %v572_v8 = vpop.xlane.xlu0 %571 }
 0x603   :  { %v575_v9 = vmul.f32 0.06666667, %v572_v8 }
 0x605   :  { %3324 = vrsqrt.f32 %v575_v9  ;;  %vm591_vm5 = vcmp.eq.f32.partialorder %v575_v9, inf  ;;  %v594_v18 = vand.u32 2147483648, %v575_v9  ;;  %vm593_vm6 = vcmp.eq.f32.partialorder %v575_v9, 0.0 }
 0x60e   :  { %v3323_v10 = vpop.eup %3322 }
 0x60f   :  { %v583_v11 = vmul.f32 %v3323_v10, %v574_v7 }
 0x611   :  { %v585_v13 = vsel %vm584_vm3, %v574_v7, %v583_v11 }
 0x612   :  { %v3325_v14 = vpop.eup %3324  ;;  %v588_v15 = vsel %vm586_vm4, %v587_v12, %v585_v13 }
 0x613   :  { %v596_v16 = vadd.f32 1e-06, %v588_v15  ;;  %v590_v17 = vmul.f32 %v3325_v14, %v575_v9 }
 0x615   :  { %3326 = vrcp.f32 %v596_v16  ;;  %v592_v19 = vsel %vm591_vm5, %v575_v9, %v590_v17  ;;  %v983_v16 = vsub.s32 2, %v3578_v52 }
 0x616   :  { %v595_v20 = vsel %vm593_vm6, %v594_v18, %v592_v19 }
 0x617   :  { %v597_v21 = vadd.f32 1e-06, %v595_v20 }
 0x619   :  { %3328 = vrcp.f32 %v597_v21 }
 0x622   :  { %v3327_v24 = vpop.eup %3326 }
 0x623   :  { %v599_v26 = vmul.f32 %v3327_v24, %v580_v23 }
 0x625   :  { %v606_v28 = vadd.f32 %v2865_v25, %v599_v26 }
 0x626   :  { %v3329_v29 = vpop.eup %3328 }
 0x627   :  { %v601_v30 = vmul.f32 %v3329_v29, %v581_v27  ;;  %3085 = vmatprep.mubr.msk.f32.mxu0 %vm49_vm0, %v606_v28 }
 0x629   :  { %v607_v31 = vadd.f32 %v2865_v25, %v601_v30 }
 0x62b   :  { %3086 = vmatmul.mubr.msk.f32.vlgmr.msra.gmra.mxu0 %vm49_vm0, %v607_v31 }
 0x62c   :  { %3100 = vmatpush3.msra.mxu0 %v3517_v63  ;;  %3107 = vmatprep.mubr.msk.f32.mxu0 %vm3441_vm1, %v3440_v4 }
 0x62d   :  { %3101 = vmatprep.subr.mxu0 %v3440_v4 }
 0x62e   :  { %3102 = vmatpush3.msra.mxu0 %v3519_v0 }
 0x62f   :  { %3103 = vmatprep.subr.mxu0 %v3440_v4 }
 0x630   :  { %3104 = vmatpush3.msra.mxu0 %v3523_v2 }
 0x631   :  { %3105 = vmatprep.subr.mxu0 %v3440_v4 }
 0x632   :  { %3106 = vmatpush3.msra.mxu0 %v3529_v3 }
 0x633   :  { %3121 = vmatprep.subr.mxu0 %v3440_v4 }
 0x6eb   :  { %v3087_v36 = vpop.f32.mrf.mxu0 }
 0x6ec   :  { %v3558_v37 = vadd.f32 %v3087_v36, %v2866_v34 }
 0x6ed   :  { %v687_v38 = vpop.f32.mrf.mxu0 }
 0x6ee   :  { %v3560_v39 = vadd.f32 %v2866_v34, %v687_v38  ;;  %v781_v40 = vadd.f32 %v777_v35, %v3558_v37  ;;  %v1082_v34 = vsub.s32 3, %v3578_v52 }
 0x6f0   :  { %v780_v41 = vadd.f32 %v772_v32, %v3560_v39  ;;  %3330 = vtanh.f32 %v781_v40 }
 0x6f2   :  { %3332 = vtanh.f32 %v780_v41 }
 0x6fd   :  { %v3331_v42 = vpop.eup %3330 }
 0x6fe   :  { %v799_v43 = vrot.slane %v3331_v42, 7  ;;  %v792_v55 = vrot.slane %v3331_v42, %v787_v53 }
 0x6ff   :  { %v3333_v44 = vpop.eup %3332 }
 0x700   :  { %v801_v45 = vsel %vm800_vm7, %v799_v43, %v3333_v44  ;;  %v788_v58 = vrot.slane %v3333_v44, %v787_v53  ;;  %v794_v61 = vsel %vm784_vm9, %v792_v55, 0.0  ;;  %v1181_v55 = vsub.s32 4, %v3578_v52 }
 0x701   :  { %3108 = vmatmul.mubr.msk.f32.vlgmr.msra.gmra.mxu0 %vm702_vm8, %v801_v45 }
 0x702   :  { %3122 = vmatpush3.msra.mxu0 %v3517_v63  ;;  %3129 = vmatprep.mubr.msk.f32.mxu0 %vm3441_vm1, %v3440_v4  ;;  %v793_v7 = vsel %vm784_vm9, %v788_v58, 0.0 }
 0x703   :  { %3123 = vmatprep.subr.mxu0 %v3440_v4 }
 0x704   :  { %3124 = vmatpush3.msra.mxu0 %v3519_v0 }
 0x705   :  { %3125 = vmatprep.subr.mxu0 %v3440_v4 }
 0x706   :  { %3126 = vmatpush3.msra.mxu0 %v3523_v2 }
 0x707   :  { %3127 = vmatprep.subr.mxu0 %v3440_v4 }
 0x708   :  { %3128 = vmatpush3.msra.mxu0 %v3529_v3 }
 0x709   :  { %3143 = vmatprep.subr.mxu0 %v3440_v4 }
 0x7c1   :  { %v870_v46 = vpop.f32.mrf.mxu0 }
 0x7c2   :  { %v875_v47 = vrot.slane %v870_v46, 7  ;;  %v879_v48 = vadd.f32 %v870_v46, %v3558_v37 }
 0x7c3   :  { %v3109_v49 = vpop.f32.mrf.mxu0 }
 0x7c4   :  { %v878_v51 = vadd.f32 %v875_v47, %v3560_v39  ;;  %3334 = vtanh.f32 %v879_v48 }
 0x7c6   :  { %3336 = vtanh.f32 %v878_v51 }
 0x7d1   :  { %v3335_v56 = vpop.eup %3334 }
 0x7d2   :  { %v890_v57 = vrot.slane %v3335_v56, %v885_v54 }
 0x7d3   :  { %v3337_v59 = vpop.eup %3336 }
 0x7d4   :  { %v897_v60 = vrot.slane %v3337_v59, 1  ;;  %v892_v62 = vsel %vm882_vm10, %v890_v57, 0.0  ;;  %v886_v1 = vrot.slane %v3337_v59, %v885_v54 }
 0x7d5   :  { %v894_v5 = vadd.f32 %v892_v62, %v794_v61 }
 0x7d6   :  { %v898_v6 = vsel %vm800_vm7, %v3335_v56, %v897_v60  ;;  %v891_v8 = vsel %vm882_vm10, %v886_v1, 0.0 }
 0x7d7   :  { %3119 = vmatmul.mubr.msk.f32.vlgmr.msra.gmra.mxu1 %vm702_vm8, %v898_v6  ;;  %v893_v9 = vadd.f32 %v891_v8, %v793_v7 }
 0x7d8   :  { %3133 = vmatpush3.msra.mxu1 %v3517_v63  ;;  %3140 = vmatprep.mubr.msk.f32.mxu1 %vm3441_vm1, %v3440_v4 }
 0x7d9   :  { %3134 = vmatprep.subr.mxu1 %v3440_v4 }
 0x7da   :  { %3135 = vmatpush3.msra.mxu1 %v3519_v0 }
 0x7db   :  { %3136 = vmatprep.subr.mxu1 %v3440_v4 }
 0x7dc   :  { %3137 = vmatpush3.msra.mxu1 %v3523_v2 }
 0x7dd   :  { %3138 = vmatprep.subr.mxu1 %v3440_v4 }
 0x7de   :  { %3139 = vmatpush3.msra.mxu1 %v3529_v3 }
 0x7df   :  { %3154 = vmatprep.subr.mxu1 %v3440_v4 }
 0x897   :  { %v967_v10 = vpop.f32.mrf.mxu1 }
 0x898   :  { %v972_v11 = vrot.slane %v967_v10, 6  ;;  %v973_v12 = vrot.slane %v967_v10, 7 }
 0x899   :  { %v3120_v13 = vpop.f32.mrf.mxu1 }
 0x89a   :  { %v976_v14 = vadd.f32 %v972_v11, %v3560_v39  ;;  %v977_v15 = vadd.f32 %v973_v12, %v3558_v37 }
 0x89c   :  { %3338 = vtanh.f32 %v976_v14 }
 0x89d   :  { %3340 = vtanh.f32 %v977_v15 }
 0x8a9   :  { %v3339_v17 = vpop.eup %3338 }
 0x8aa   :  { %v3341_v18 = vpop.eup %3340  ;;  %v995_v19 = vrot.slane %v3339_v17, 2  ;;  %v984_v20 = vrot.slane %v3339_v17, %v983_v16 }
 0x8ab   :  { %v996_v21 = vrot.slane %v3341_v18, 1  ;;  %v988_v22 = vrot.slane %v3341_v18, %v983_v16 }
 0x8ac   :  { %v989_v23 = vsel %vm980_vm11, %v984_v20, 0.0 }
 0x8ad   :  { %v997_v24 = vsel %vm800_vm7, %v996_v21, %v995_v19  ;;  %v990_v25 = vsel %vm980_vm11, %v988_v22, 0.0  ;;  %v991_v26 = vadd.f32 %v989_v23, %v893_v9 }
 0x8ae   :  { %3130 = vmatmul.mubr.msk.f32.vlgmr.msra.gmra.mxu0 %vm702_vm8, %v997_v24  ;;  %v992_v27 = vadd.f32 %v990_v25, %v894_v5 }
 0x8af   :  { %3144 = vmatpush3.msra.mxu0 %v3517_v63  ;;  %3151 = vmatprep.mubr.msk.f32.mxu0 %vm3441_vm1, %v3440_v4 }
 0x8b0   :  { %3145 = vmatprep.subr.mxu0 %v3440_v4 }
 0x8b1   :  { %3146 = vmatpush3.msra.mxu0 %v3519_v0 }
 0x8b2   :  { %3147 = vmatprep.subr.mxu0 %v3440_v4 }
 0x8b3   :  { %3148 = vmatpush3.msra.mxu0 %v3523_v2 }
 0x8b4   :  { %3149 = vmatprep.subr.mxu0 %v3440_v4 }
 0x8b5   :  { %3150 = vmatpush3.msra.mxu0 %v3529_v3 }
 0x8b6   :  { %3165 = vmatprep.subr.mxu0 %v3440_v4 }
 0x96e   :  { %v1066_v28 = vpop.f32.mrf.mxu0 }
 0x96f   :  { %v1071_v29 = vrot.slane %v1066_v28, 5  ;;  %v1072_v30 = vrot.slane %v1066_v28, 6 }
 0x970   :  { %v3131_v31 = vpop.f32.mrf.mxu0 }
 0x971   :  { %v1075_v32 = vadd.f32 %v1071_v29, %v3560_v39  ;;  %v1076_v33 = vadd.f32 %v1072_v30, %v3558_v37 }
 0x973   :  { %3342 = vtanh.f32 %v1075_v32 }
 0x974   :  { %3344 = vtanh.f32 %v1076_v33 }
 0x980   :  { %v3343_v35 = vpop.eup %3342 }
 0x981   :  { %v3345_v36 = vpop.eup %3344  ;;  %v1094_v38 = vrot.slane %v3343_v35, 3  ;;  %v1083_v40 = vrot.slane %v3343_v35, %v1082_v34 }
 0x982   :  { %v1095_v41 = vrot.slane %v3345_v36, 2  ;;  %v1087_v42 = vrot.slane %v3345_v36, %v1082_v34 }
 0x983   :  { %v1088_v43 = vsel %vm1079_vm12, %v1083_v40, 0.0 }
 0x984   :  { %v1096_v44 = vsel %vm800_vm7, %v1095_v41, %v1094_v38  ;;  %v1089_v45 = vsel %vm1079_vm12, %v1087_v42, 0.0  ;;  %v1090_v46 = vadd.f32 %v1088_v43, %v991_v26 }
 0x985   :  { %3141 = vmatmul.mubr.msk.f32.vlgmr.msra.gmra.mxu1 %vm702_vm8, %v1096_v44  ;;  %v1091_v47 = vadd.f32 %v1089_v45, %v992_v27  ;;  %v1379_v27 = vsub.s32 6, %v3578_v52 }
 0x986   :  { %3155 = vmatpush3.msra.mxu1 %v3517_v63  ;;  %3162 = vmatprep.mubr.msk.f32.mxu1 %vm3441_vm1, %v3440_v4 }
 0x987   :  { %3156 = vmatprep.subr.mxu1 %v3440_v4 }
 0x988   :  { %3157 = vmatpush3.msra.mxu1 %v3519_v0 }
 0x989   :  { %3158 = vmatprep.subr.mxu1 %v3440_v4 }
 0x98a   :  { %3159 = vmatpush3.msra.mxu1 %v3523_v2 }
 0x98b   :  { %3160 = vmatprep.subr.mxu1 %v3440_v4 }
 0x98c   :  { %3161 = vmatpush3.msra.mxu1 %v3529_v3 }
 0xa45   :  { %v1165_v48 = vpop.f32.mrf.mxu1 }
 0xa46   :  { %v1170_v49 = vrot.slane %v1165_v48, 4  ;;  %v1171_v50 = vrot.slane %v1165_v48, 5 }
 0xa47   :  { %v3142_v51 = vpop.f32.mrf.mxu1 }
 0xa48   :  { %v1174_v53 = vadd.f32 %v1170_v49, %v3560_v39  ;;  %v1175_v54 = vadd.f32 %v1171_v50, %v3558_v37 }
 0xa4a   :  { %3346 = vtanh.f32 %v1174_v53 }
 0xa4b   :  { %3348 = vtanh.f32 %v1175_v54 }
 0xa57   :  { %v3347_v56 = vpop.eup %3346 }
 0xa58   :  { %v3349_v57 = vpop.eup %3348  ;;  %v1193_v58 = vrot.slane %v3347_v56, 4  ;;  %v1182_v59 = vrot.slane %v3347_v56, %v1181_v55 }
 0xa59   :  { %v1194_v60 = vrot.slane %v3349_v57, 3  ;;  %v1186_v61 = vrot.slane %v3349_v57, %v1181_v55 }
 0xa5a   :  { %v1187_v62 = vsel %vm1178_vm13, %v1182_v59, 0.0 }
 0xa5b   :  { %v1195_v1 = vsel %vm800_vm7, %v1194_v60, %v1193_v58  ;;  %v1188_v5 = vsel %vm1178_vm13, %v1186_v61, 0.0  ;;  %v1189_v6 = vadd.f32 %v1187_v62, %v1090_v46 }
 0xa5c   :  { %3152 = vmatmul.mubr.msk.f32.vlgmr.msra.gmra.mxu0 %vm702_vm8, %v1195_v1  ;;  %v1190_v7 = vadd.f32 %v1188_v5, %v1091_v47  ;;  %v1478_v47 = vsub.s32 7, %v3578_v52 }
 0xa5d   :  { %3166 = vmatpush3.msra.mxu0 %v3517_v63  ;;  %3173 = vmatprep.mubr.msk.f32.mxu0 %vm3441_vm1, %v3440_v4  ;;  %vm1475_vm1 = vcmp.eq.s32.totalorder %v3578_v52, 7 }
 0xa5e   :  { %3167 = vmatprep.subr.mxu0 %v3440_v4 }
 0xa5f   :  { %3168 = vmatpush3.msra.mxu0 %v3519_v0  ;;  %v1280_v0 = vsub.s32 5, %v3578_v52 }
 0xa60   :  { %3169 = vmatprep.subr.mxu0 %v3440_v4 }
 0xa61   :  { %3170 = vmatpush3.msra.mxu0 %v3523_v2 }
 0xa62   :  { %3171 = vmatprep.subr.mxu0 %v3440_v4 }
 0xa63   :  { %3172 = vmatpush3.msra.mxu0 %v3529_v3 }
 0xb1c   :  { %v1264_v8 = vpop.f32.mrf.mxu0 }
 0xb1d   :  { %v1269_v9 = vrot.slane %v1264_v8, 3  ;;  %v1270_v10 = vrot.slane %v1264_v8, 4  ;;  %v1633_v8 = vld [vmem:[#allocation5 + $0xc8] sm:$0xff] }
 0xb1e   :  { %v3153_v11 = vpop.f32.mrf.mxu0 }
 0xb1f   :  { %v1273_v63 = vadd.f32 %v1269_v9, %v3560_v39  ;;  %v1274_v12 = vadd.f32 %v1270_v10, %v3558_v37  ;;  %v1632_v9 = vld [vmem:[#allocation5 + $0xc0] sm:$0xff]  ;;  %v1631_v10 = vld [vmem:[#allocation5 + $0xb8] sm:$0xff]  ;;  %v1544_v11 = vld [vmem:[#allocation5 + $0x88] sm:$0xff] }
 0xb21   :  { %3350 = vtanh.f32 %v1273_v63 }
 0xb22   :  { %3352 = vtanh.f32 %v1274_v12 }
 0xb2e   :  { %v3351_v13 = vpop.eup %3350 }
 0xb2f   :  { %v3353_v2 = vpop.eup %3352  ;;  %v1292_v14 = vrot.slane %v3351_v13, 5  ;;  %v1281_v4 = vrot.slane %v3351_v13, %v1280_v0 }
 0xb30   :  { %v1293_v15 = vrot.slane %v3353_v2, 4  ;;  %v1285_v3 = vrot.slane %v3353_v2, %v1280_v0 }
 0xb31   :  { %v1286_v16 = vsel %vm1277_vm14, %v1281_v4, 0.0 }
 0xb32   :  { %v1294_v17 = vsel %vm800_vm7, %v1293_v15, %v1292_v14  ;;  %v1287_v18 = vsel %vm1277_vm14, %v1285_v3, 0.0  ;;  %v1288_v19 = vadd.f32 %v1286_v16, %v1189_v6 }
 0xb33   :  { %3163 = vmatmul.mubr.msk.f32.vlgmr.msra.gmra.mxu1 %vm702_vm8, %v1294_v17  ;;  %v1289_v20 = vadd.f32 %v1287_v18, %v1190_v7  ;;  %v1634_v7 = vld [vmem:[#allocation5 + $0xd0] sm:$0xff] }
 0xb34   :  { %3183 = vmatprep.subr.mxu0 %v1634_v7  ;;  %3180 = vmatprep.mubr.msk.f32.mxu1 %vm49_vm0, %v1544_v11 }
 0xbf3   :  { %v1363_v21 = vpop.f32.mrf.mxu1 }
 0xbf4   :  { %v1368_v22 = vrot.slane %v1363_v21, 2  ;;  %v1369_v23 = vrot.slane %v1363_v21, 3 }
 0xbf5   :  { %v3164_v24 = vpop.f32.mrf.mxu1 }
 0xbf6   :  { %v1372_v25 = vadd.f32 %v1368_v22, %v3560_v39  ;;  %v1373_v26 = vadd.f32 %v1369_v23, %v3558_v37  ;;  %v2876_v23 = vld [vmem:[#allocation5 + $0x78] ss:$0 sm:$0xff] }
 0xbf8   :  { %3354 = vtanh.f32 %v1372_v25 }
 0xbf9   :  { %3356 = vtanh.f32 %v1373_v26  ;;  %v2877_v26 = vld [vmem:[#allocation5 + $0x80] ss:$0 sm:$0xff] }
 0xc05   :  { %v3355_v28 = vpop.eup %3354 }
 0xc06   :  { %v3357_v29 = vpop.eup %3356  ;;  %v1391_v30 = vrot.slane %v3355_v28, 6  ;;  %v1380_v31 = vrot.slane %v3355_v28, %v1379_v27 }
 0xc07   :  { %v1392_v32 = vrot.slane %v3357_v29, 5  ;;  %v1384_v33 = vrot.slane %v3357_v29, %v1379_v27 }
 0xc08   :  { %v1385_v34 = vsel %vm1376_vm15, %v1380_v31, 0.0 }
 0xc09   :  { %v1393_v35 = vsel %vm800_vm7, %v1392_v32, %v1391_v30  ;;  %v1386_v36 = vsel %vm1376_vm15, %v1384_v33, 0.0  ;;  %v1387_v38 = vadd.f32 %v1385_v34, %v1288_v19  ;;  %v1545_v33 = vld [vmem:[#allocation5 + $0x90] sm:$0xff] }
 0xc0a   :  { %3174 = vmatmul.mubr.msk.f32.vlgmr.msra.gmra.mxu0 %vm702_vm8, %v1393_v35  ;;  %v1388_v40 = vadd.f32 %v1386_v36, %v1289_v20  ;;  %v1630_v34 = vld [vmem:[#allocation5 + $0xb0] sm:$0xff]  ;;  %v1629_v35 = vld [vmem:[#allocation5 + $0xa8] sm:$0xff]  ;;  %v1628_v36 = vld [vmem:[#allocation5 + $0xa0] sm:$0xff] }
 0xc0b   :  { %3184 = vmatpush3.msra.mxu0 %v1634_v7  ;;  %v2891_v7 = vld [vmem:[#allocation5 + $0x100] ss:$0 sm:$0xff] }
 0xc0c   :  { %3185 = vmatprep.subr.mxu0 %v1633_v8 }
 0xc0d   :  { %3186 = vmatpush3.msra.mxu0 %v1633_v8 }
 0xc0e   :  { %3187 = vmatprep.subr.mxu0 %v1632_v9 }
 0xc0f   :  { %3188 = vmatpush3.msra.mxu0 %v1632_v9  ;;  %v2892_v9 = vld [vmem:[#allocation5 + $0x128] ss:$0 sm:$0xff] }
 0xc10   :  { %3189 = vmatprep.subr.mxu0 %v1631_v10 }
 0xc11   :  { %3190 = vmatpush3.msra.mxu0 %v1631_v10 }
 0xcca   :  { %v1462_v41 = vpop.f32.mrf.mxu0 }
 0xccb   :  { %v1467_v42 = vrot.slane %v1462_v41, 1  ;;  %v1468_v43 = vrot.slane %v1462_v41, 2 }
 0xccc   :  { %v3175_v44 = vpop.f32.mrf.mxu0 }
 0xccd   :  { %v1471_v45 = vadd.f32 %v1467_v42, %v3560_v39  ;;  %v1472_v46 = vadd.f32 %v1468_v43, %v3558_v37  ;;  %v1884_v42 = vld [vmem:[#allocation5 + $0xf8] sm:$0xff]  ;;  %v1883_v43 = vld [vmem:[#allocation5 + $0xf0] sm:$0xff]  ;;  %v2059_v44 = vld [vmem:[#allocation5 + $0x120] sm:$0xff] }
 0xccf   :  { %3358 = vtanh.f32 %v1471_v45 }
 0xcd0   :  { %3360 = vtanh.f32 %v1472_v46 }
 0xcdc   :  { %v3359_v48 = vpop.eup %3358 }
 0xcdd   :  { %v3361_v49 = vpop.eup %3360  ;;  %v1479_v50 = vrot.slane %v3359_v48, %v1478_v47 }
 0xcde   :  { %v1483_v51 = vrot.slane %v3361_v49, %v1478_v47  ;;  %v2884_v47 = vld [vmem:[#allocation5 + $0xd8] ss:$0 sm:$0xff] }
 0xcdf   :  { %v1484_v54 = vsel %vm1475_vm1, %v1479_v50, 0.0 }
 0xce0   :  { %v1485_v53 = vsel %vm1475_vm1, %v1483_v51, 0.0  ;;  %v1486_v57 = vadd.f32 %v1484_v54, %v1387_v38  ;;  %v1627_v38 = vld [vmem:[#allocation5 + $0x98] sm:$0xff] }
 0xce1   :  { %v1487_v55 = vadd.f32 %v1485_v53, %v1388_v40 }
 0xce2   :  { %v1490_v39 = vsel %vm702_vm8, %v1486_v57, 0.0 }
 0xce3   :  { %v1493_v56 = vsel %vm702_vm8, %v1487_v55, 0.0 }
 0xce4   :  { %1494 = vadd.xlane.f32.xlu0 %v1493_v56 }
 0xce8   :  { %1491 = vadd.xlane.f32.xlu0 %v1490_v39  ;;  %v2057_v39 = vld [vmem:[#allocation5 + $0x110] sm:$0xff] }
 0xd6d   :  { %v1495_v37 = vpop.xlane.xlu0 %1494 }
 0xd6e   :  { %v1498_v58 = vmul.f32 0.03125, %v1495_v37  ;;  %v2056_v37 = vld [vmem:[#allocation5 + $0x108] sm:$0xff] }
 0xd70   :  { %v1500_v59 = vsub.f32 %v1487_v55, %v1498_v58  ;;  %v1882_v58 = vld [vmem:[#allocation5 + $0xe8] sm:$0xff] }
 0xd71   :  { %v1492_v60 = vpop.xlane.xlu0 %1491 }
 0xd72   :  { %v1497_v61 = vmul.f32 0.03125, %v1492_v60  ;;  %v1502_v62 = vmul.f32 %v1500_v59, %v1500_v59  ;;  %v1517_v24 = vmul.f32 %v2876_v23, %v1500_v59  ;;  %v1881_v59 = vld [vmem:[#allocation5 + $0xe0] sm:$0xff] }
 0xd74   :  { %v1499_v1 = vsub.f32 %v1486_v57, %v1497_v61  ;;  %v1506_v52 = vsel %vm702_vm8, %v1502_v62, 0.0  ;;  %v2058_v57 = vld [vmem:[#allocation5 + $0x118] sm:$0xff]  ;;  %v2144_v62 = vld [vmem:[#allocation5 + $0x130] sm:$0xff] }
 0xd75   :  { %1507 = vadd.xlane.f32.xlu0 %v1506_v52 }
 0xd76   :  { %v1501_v5 = vmul.f32 %v1499_v1, %v1499_v1  ;;  %v1516_v28 = vmul.f32 %v2876_v23, %v1499_v1 }
 0xd78   :  { %v1503_v6 = vsel %vm702_vm8, %v1501_v5, 0.0 }
 0xd79   :  { %1504 = vadd.xlane.f32.xlu0 %v1503_v6 }
 0xdfe   :  { %v1508_v63 = vpop.xlane.xlu0 %1507 }
 0xdff   :  { %v1511_v12 = vmul.f32 0.032258064, %v1508_v63 }
 0xe01   :  { %3362 = vrsqrt.f32 %v1511_v12  ;;  %vm1527_vm3 = vcmp.eq.f32.partialorder %v1511_v12, inf  ;;  %v1530_v4 = vand.u32 2147483648, %v1511_v12  ;;  %vm1529_vm4 = vcmp.eq.f32.partialorder %v1511_v12, 0.0 }
 0xe02   :  { %v1505_v0 = vpop.xlane.xlu0 %1504 }
 0xe03   :  { %v1510_v13 = vmul.f32 0.032258064, %v1505_v0 }
 0xe05   :  { %3364 = vrsqrt.f32 %v1510_v13  ;;  %vm1520_vm5 = vcmp.eq.f32.partialorder %v1510_v13, inf  ;;  %v1523_v19 = vand.u32 2147483648, %v1510_v13  ;;  %vm1522_vm6 = vcmp.eq.f32.partialorder %v1510_v13, 0.0 }
 0xe0e   :  { %v3363_v2 = vpop.eup %3362 }
 0xe0f   :  { %v1526_v14 = vmul.f32 %v3363_v2, %v1511_v12 }
 0xe11   :  { %v1528_v15 = vsel %vm1527_vm3, %v1511_v12, %v1526_v14 }
 0xe12   :  { %v3365_v3 = vpop.eup %3364  ;;  %v1531_v16 = vsel %vm1529_vm4, %v1530_v4, %v1528_v15 }
 0xe13   :  { %v1533_v17 = vadd.f32 1e-06, %v1531_v16  ;;  %v1519_v18 = vmul.f32 %v3365_v3, %v1510_v13 }
 0xe15   :  { %3366 = vrcp.f32 %v1533_v17  ;;  %v1521_v20 = vsel %vm1520_vm5, %v1510_v13, %v1519_v18  ;;  %v2145_v18 = vld [vmem:[#allocation5 + $0x138] sm:$0xff] }
 0xe16   :  { %v1524_v21 = vsel %vm1522_vm6, %v1523_v19, %v1521_v20  ;;  %v2230_v19 = vld [vmem:[#allocation5 + $0x158] sm:$0xff]  ;;  %v2229_v20 = vld [vmem:[#allocation5 + $0x150] sm:$0xff] }
 0xe17   :  { %v1532_v22 = vadd.f32 1e-06, %v1524_v21  ;;  %v2228_v21 = vld [vmem:[#allocation5 + $0x148] sm:$0xff] }
 0xe19   :  { %3368 = vrcp.f32 %v1532_v22  ;;  %v2227_v22 = vld [vmem:[#allocation5 + $0x140] sm:$0xff] }
 0xe22   :  { %v3367_v25 = vpop.eup %3366 }
 0xe23   :  { %v1537_v27 = vmul.f32 %v3367_v25, %v1517_v24  ;;  %v2484_v25 = vld [vmem:[#allocation5 + $0x1a0] sm:$0xff] }
 0xe25   :  { %v3663_v29 = vadd.f32 %v2877_v26, %v1537_v27  ;;  %v2482_v27 = vld [vmem:[#allocation5 + $0x190] sm:$0xff] }
 0xe26   :  { %v3369_v30 = vpop.eup %3368 }
 0xe27   :  { %3176 = vmatprep.subr.mxu1 %v3663_v29  ;;  %v1535_v31 = vmul.f32 %v3369_v30, %v1516_v28  ;;  %v2481_v28 = vld [vmem:[#allocation5 + $0x188] sm:$0xff] }
 0xe28   :  { %3177 = vmatpush3.msra.mxu1 %v3663_v29 }
 0xe29   :  { %v1542_v32 = vadd.f32 %v2877_v26, %v1535_v31  ;;  %v2483_v26 = vld [vmem:[#allocation5 + $0x198] sm:$0xff] }
 0xe2b   :  { %3178 = vmatprep.subr.mxu1 %v1542_v32  ;;  %3191 = vmatprep.mubr.msk.f32.mxu0 %vm702_vm8, %v1542_v32 }
 0xe2c   :  { %3179 = vmatpush3.msra.mxu1 %v1542_v32  ;;  %3192 = vmatmul.mubr.msk.f32.vlgmr.msra.gmra.mxu0 %vm702_vm8, %v3663_v29 }
 0xe2d   :  { %3181 = vmatmul.mubr.msk.f32.vlgmr.msra.gmra.mxu1 %vm49_vm0, %v1545_v33  ;;  %3194 = vmatprep.subr.mxu1 %v1630_v34 }
 0xe2e   :  { %3195 = vmatpush3.msra.mxu1 %v1630_v34  ;;  %3209 = vmatprep.mubr.msk.f32.mxu0 %vm49_vm0, %v1544_v11 }
 0xe2f   :  { %3196 = vmatprep.subr.mxu1 %v1629_v35 }
 0xe30   :  { %3197 = vmatpush3.msra.mxu1 %v1629_v35 }
 0xe31   :  { %3198 = vmatprep.subr.mxu1 %v1628_v36 }
 0xe32   :  { %3199 = vmatpush3.msra.mxu1 %v1628_v36 }
 0xe33   :  { %3200 = vmatprep.subr.mxu1 %v1627_v38 }
 0xe34   :  { %3201 = vmatpush3.msra.mxu1 %v1627_v38 }
 0xe35   :  { %3212 = vmatprep.subr.mxu1 %v1884_v42 }
 0xeec   :  { %v3193_v45 = vpop.f32.mrf.mxu0 }
 0xeed   :  { %v3182_v40 = vpop.f32.mrf.mxu1 }
 0xeee   :  { %v1707_v49 = vpop.f32.mrf.mxu0 }
 0xeef   :  { %v1618_v41 = vpop.f32.mrf.mxu1 }
 0xef0   :  { %3202 = vmatprep.mubr.msk.f32.mxu1 %vm702_vm8, %v1618_v41 }
 0xef1   :  { %3203 = vmatmul.mubr.msk.f32.vlgmr.msra.gmra.mxu1 %vm702_vm8, %v3182_v40 }
 0xef2   :  { %3213 = vmatpush3.msra.mxu1 %v1884_v42 }
 0xef3   :  { %3214 = vmatprep.subr.mxu1 %v1883_v43 }
 0xef4   :  { %3215 = vmatpush3.msra.mxu1 %v1883_v43  ;;  %v2656_v43 = vld [vmem:[#allocation5 + $0x1b0] sm:$0xff] }
 0xef5   :  { %3226 = vmatprep.subr.mxu1 %v2059_v44 }
 0xfb1   :  { %v3204_v46 = vpop.f32.mrf.mxu1 }
 0xfb2   :  { %v1794_v48 = vadd.f32 %v3204_v46, %v3193_v45  ;;  %v2479_v45 = vld [vmem:[#allocation5 + $0x178] sm:$0xff]  ;;  %v2478_v46 = vld [vmem:[#allocation5 + $0x170] sm:$0xff] }
 0xfb3   :  { %v1788_v50 = vpop.f32.mrf.mxu1 }
 0xfb4   :  { %v1803_v51 = vadd.f32 %v2884_v47, %v1794_v48  ;;  %v1789_v53 = vadd.f32 %v1788_v50, %v1707_v49  ;;  %v2745_v50 = vld [vmem:[#allocation5 + $0x1e0] sm:$0xff] }
 0xfb6   :  { %v1805_v54 = vmax.f32 %v1803_v51, 0.0  ;;  %v1802_v55 = vadd.f32 %v2884_v47, %v1789_v53  ;;  %v2477_v47 = vld [vmem:[#allocation5 + $0x168] sm:$0xff]  ;;  %v2744_v51 = vld [vmem:[#allocation5 + $0x1d8] sm:$0xff]  ;;  %v2743_v53 = vld [vmem:[#allocation5 + $0x1d0] sm:$0xff] }
 0xfb8   :  { %v1804_v56 = vmax.f32 %v1802_v55, 0.0  ;;  %3205 = vmatprep.subr.mxu0 %v1805_v54 }
 0xfb9   :  { %3206 = vmatpush3.msra.mxu0 %v1805_v54 }
 0xfba   :  { %3207 = vmatprep.subr.mxu0 %v1804_v56  ;;  %3216 = vmatprep.mubr.msk.f32.mxu1 %vm49_vm0, %v1804_v56 }
 0xfbb   :  { %3208 = vmatpush3.msra.mxu0 %v1804_v56  ;;  %3217 = vmatmul.mubr.msk.f32.vlgmr.msra.gmra.mxu1 %vm49_vm0, %v1805_v54  ;;  %v2742_v54 = vld [vmem:[#allocation5 + $0x1c8] sm:$0xff] }
 0xfbc   :  { %3227 = vmatpush3.msra.mxu1 %v2059_v44  ;;  %3210 = vmatmul.mubr.msk.f32.vlgmr.msra.gmra.mxu0 %vm49_vm0, %v1545_v33  ;;  %v2480_v44 = vld [vmem:[#allocation5 + $0x180] sm:$0xff] }
 0xfbd   :  { %3228 = vmatprep.subr.mxu1 %v2058_v57  ;;  %3234 = vmatprep.mubr.msk.f32.mxu1 %vm702_vm8, %v1542_v32  ;;  %v2901_v32 = vld [vmem:[#allocation5 + $0x160] ss:$0 sm:$0xff] }
 0xfbe   :  { %3229 = vmatpush3.msra.mxu1 %v2058_v57  ;;  %3219 = vmatprep.subr.mxu0 %v1882_v58 }
 0xfbf   :  { %3230 = vmatprep.subr.mxu1 %v2057_v39  ;;  %3220 = vmatpush3.msra.mxu0 %v1882_v58 }
 0xfc0   :  { %3231 = vmatpush3.msra.mxu1 %v2057_v39  ;;  %3221 = vmatprep.subr.mxu0 %v1881_v59 }
 0xfc1   :  { %3232 = vmatprep.subr.mxu1 %v2056_v37  ;;  %3222 = vmatpush3.msra.mxu0 %v1881_v59 }
 0xfc2   :  { %3233 = vmatpush3.msra.mxu1 %v2056_v37  ;;  %v2908_v37 = vld [vmem:[#allocation5 + $0x1a8] ss:$0 sm:$0xff] }
 0xfc3   :  { %3235 = vmatmul.mubr.msk.f32.vlgmr.msra.gmra.mxu1 %vm702_vm8, %v3663_v29  ;;  %3251 = vmatprep.subr.mxu1 %v2228_v21  ;;  %v2657_v29 = vld [vmem:[#allocation5 + $0x1b8] sm:$0xff] }
 0xfc4   :  { %3252 = vmatpush3.msra.mxu1 %v2228_v21 }
 0xfc5   :  { %3253 = vmatprep.subr.mxu1 %v2227_v22 }
 0xfc6   :  { %3254 = vmatpush3.msra.mxu1 %v2227_v22 }
 0xfc7   :  { %3265 = vmatprep.subr.mxu1 %v2484_v25 }
0x107b   :  { %v3218_v1 = vpop.f32.mrf.mxu1 }
0x107c   :  { %v3211_v60 = vpop.f32.mrf.mxu0 }
0x107d   :  { %v1957_v52 = vpop.f32.mrf.mxu1 }
0x107e   :  { %v1872_v61 = vpop.f32.mrf.mxu0 }
0x107f   :  { %3223 = vmatprep.mubr.msk.f32.mxu0 %vm49_vm0, %v1872_v61 }
0x1080   :  { %3224 = vmatmul.mubr.msk.f32.vlgmr.msra.gmra.mxu0 %vm49_vm0, %v3211_v60  ;;  %v2909_v60 = vld [vmem:[#allocation5 + $0x1c0] ss:$0 sm:$0xff] }
0x1081   :  { %3241 = vmatprep.mubr.msk.f32.mxu0 %vm49_vm0, %v2144_v62 }
0x1083   :  { %v3236_v5 = vpop.f32.mrf.mxu1 }
0x1084   :  { %v2137_v0 = vadd.f32 %v3236_v5, %v2892_v9 }
0x1085   :  { %v2131_v12 = vpop.f32.mrf.mxu1 }
0x1086   :  { %v2132_v14 = vadd.f32 %v2892_v9, %v2131_v12  ;;  %v2912_v12 = vld [vmem:[#allocation5 + $0x1e8] ss:$0 sm:$0xff] }
0x1140   :  { %v3225_v6 = vpop.f32.mrf.mxu0 }
0x1141   :  { %v2044_v8 = vadd.f32 %v3225_v6, %v3218_v1 }
0x1142   :  { %v2038_v10 = vpop.f32.mrf.mxu0 }
0x1143   :  { %v2053_v11 = vadd.f32 %v2891_v7, %v2044_v8  ;;  %v2039_v63 = vadd.f32 %v2038_v10, %v1957_v52 }
0x1145   :  { %v2055_v13 = vmax.f32 %v2053_v11, 0.0  ;;  %v2052_v2 = vadd.f32 %v2891_v7, %v2039_v63 }
0x1147   :  { %v2141_v4 = vadd.f32 %v2137_v0, %v2055_v13  ;;  %v2054_v15 = vmax.f32 %v2052_v2, 0.0 }
0x1149   :  { %v3683_v3 = vmax.f32 %v2141_v4, 0.0  ;;  %v2140_v16 = vadd.f32 %v2132_v14, %v2054_v15 }
0x114b   :  { %v2142_v17 = vmax.f32 %v2140_v16, 0.0  ;;  %3237 = vmatprep.subr.mxu0 %v3683_v3 }
0x114c   :  { %3238 = vmatpush3.msra.mxu0 %v3683_v3 }
0x114d   :  { %3239 = vmatprep.subr.mxu0 %v2142_v17 }
0x114e   :  { %3240 = vmatpush3.msra.mxu0 %v2142_v17 }
0x114f   :  { %3242 = vmatmul.mubr.msk.f32.vlgmr.msra.gmra.mxu0 %vm49_vm0, %v2145_v18  ;;  %3244 = vmatprep.subr.mxu0 %v2230_v19 }
0x1150   :  { %3245 = vmatpush3.msra.mxu0 %v2230_v19  ;;  %3248 = vmatprep.mubr.msk.f32.mxu0 %vm49_vm0, %v2142_v17 }
0x1151   :  { %3246 = vmatprep.subr.mxu0 %v2229_v20 }
0x1152   :  { %3247 = vmatpush3.msra.mxu0 %v2229_v20 }
0x1153   :  { %3249 = vmatmul.mubr.msk.f32.vlgmr.msra.gmra.mxu0 %vm49_vm0, %v3683_v3 }
0x1154   :  { %3262 = vmatprep.mubr.msk.f32.mxu0 %vm49_vm0, %v2144_v62 }
0x120f   :  { %v3243_v23 = vpop.f32.mrf.mxu0 }
0x1211   :  { %v2218_v24 = vpop.f32.mrf.mxu0 }
0x1212   :  { %3255 = vmatprep.mubr.msk.f32.mxu1 %vm49_vm0, %v2218_v24 }
0x1213   :  { %3256 = vmatmul.mubr.msk.f32.vlgmr.msra.gmra.mxu1 %vm49_vm0, %v3243_v23  ;;  %v3250_v30 = vpop.f32.mrf.mxu0 }
0x1214   :  { %3266 = vmatpush3.msra.mxu1 %v2484_v25 }
0x1215   :  { %3267 = vmatprep.subr.mxu1 %v2483_v26  ;;  %v2303_v34 = vpop.f32.mrf.mxu0 }
0x1216   :  { %3268 = vmatpush3.msra.mxu1 %v2483_v26 }
0x1217   :  { %3269 = vmatprep.subr.mxu1 %v2482_v27 }
0x1218   :  { %3270 = vmatpush3.msra.mxu1 %v2482_v27 }
0x1219   :  { %3271 = vmatprep.subr.mxu1 %v2481_v28 }
0x121a   :  { %3272 = vmatpush3.msra.mxu1 %v2481_v28 }
0x121b   :  { %3287 = vmatprep.subr.mxu1 %v2657_v29 }
0x12d3   :  { %v3257_v31 = vpop.f32.mrf.mxu1 }
0x12d4   :  { %v2390_v33 = vadd.f32 %v3257_v31, %v3250_v30 }
0x12d5   :  { %v2384_v35 = vpop.f32.mrf.mxu1 }
0x12d6   :  { %v2399_v36 = vadd.f32 %v2901_v32, %v2390_v33  ;;  %v2385_v38 = vadd.f32 %v2384_v35, %v2303_v34 }
0x12d8   :  { %v2401_v40 = vmax.f32 %v2399_v36, 0.0  ;;  %v2398_v41 = vadd.f32 %v2901_v32, %v2385_v38 }
0x12da   :  { %v2400_v42 = vmax.f32 %v2398_v41, 0.0  ;;  %3258 = vmatprep.subr.mxu0 %v2401_v40 }
0x12db   :  { %3259 = vmatpush3.msra.mxu0 %v2401_v40 }
0x12dc   :  { %3260 = vmatprep.subr.mxu0 %v2400_v42  ;;  %3273 = vmatprep.mubr.msk.f32.mxu1 %vm702_vm8, %v2400_v42 }
0x12dd   :  { %3261 = vmatpush3.msra.mxu0 %v2400_v42  ;;  %3274 = vmatmul.mubr.msk.f32.vlgmr.msra.gmra.mxu1 %vm702_vm8, %v2401_v40 }
0x12de   :  { %3263 = vmatmul.mubr.msk.f32.vlgmr.msra.gmra.mxu0 %vm49_vm0, %v2145_v18  ;;  %3288 = vmatpush3.msra.mxu1 %v2657_v29 }
0x12df   :  { %3291 = vmatprep.mubr.msk.f32.mxu1 %vm49_vm0, %v2142_v17  ;;  %3289 = vmatprep.subr.mxu1 %v2656_v43 }
0x12e0   :  { %3290 = vmatpush3.msra.mxu1 %v2656_v43  ;;  %3276 = vmatprep.subr.mxu0 %v2480_v44 }
0x12e1   :  { %3292 = vmatmul.mubr.msk.f32.vlgmr.msra.gmra.mxu1 %vm49_vm0, %v3683_v3  ;;  %3277 = vmatpush3.msra.mxu0 %v2480_v44 }
0x12e2   :  { %3278 = vmatprep.subr.mxu0 %v2479_v45 }
0x12e3   :  { %3279 = vmatpush3.msra.mxu0 %v2479_v45 }
0x12e4   :  { %3280 = vmatprep.subr.mxu0 %v2478_v46 }
0x12e5   :  { %3281 = vmatpush3.msra.mxu0 %v2478_v46 }
0x12e6   :  { %3282 = vmatprep.subr.mxu0 %v2477_v47 }
0x12e7   :  { %3283 = vmatpush3.msra.mxu0 %v2477_v47 }
0x12e8   :  { %3294 = vmatprep.subr.mxu0 %v2745_v50 }
0x139d   :  { %v3275_v55 = vpop.f32.mrf.mxu1 }
0x139e   :  { %v3264_v48 = vpop.f32.mrf.mxu0 }
0x139f   :  { %v2557_v56 = vpop.f32.mrf.mxu1 }
0x13a0   :  { %v2468_v49 = vpop.f32.mrf.mxu0 }
0x13a1   :  { %3284 = vmatprep.mubr.msk.f32.mxu0 %vm702_vm8, %v2468_v49  ;;  %v3293_v57 = vpop.f32.mrf.mxu1 }
0x13a2   :  { %3285 = vmatmul.mubr.msk.f32.vlgmr.msra.gmra.mxu0 %vm702_vm8, %v3264_v48  ;;  %v2735_v6 = vadd.f32 %v3293_v57, %v2909_v60 }
0x13a3   :  { %3295 = vmatpush3.msra.mxu0 %v2745_v50  ;;  %v2729_v1 = vpop.f32.mrf.mxu1 }
0x13a4   :  { %3296 = vmatprep.subr.mxu0 %v2744_v51  ;;  %v2730_v7 = vadd.f32 %v2909_v60, %v2729_v1 }
0x13a5   :  { %3297 = vmatpush3.msra.mxu0 %v2744_v51 }
0x13a6   :  { %3298 = vmatprep.subr.mxu0 %v2743_v53 }
0x13a7   :  { %3299 = vmatpush3.msra.mxu0 %v2743_v53 }
0x13a8   :  { %3300 = vmatprep.subr.mxu0 %v2742_v54 }
0x13a9   :  { %3301 = vmatpush3.msra.mxu0 %v2742_v54 }
0x1462   :  { %v3286_v39 = vpop.f32.mrf.mxu0 }
0x1463   :  { %v2644_v58 = vadd.f32 %v3286_v39, %v3275_v55 }
0x1464   :  { %v2638_v59 = vpop.f32.mrf.mxu0 }
0x1465   :  { %v2653_v61 = vadd.f32 %v2908_v37, %v2644_v58  ;;  %v2639_v62 = vadd.f32 %v2638_v59, %v2557_v56 }
0x1467   :  { %v2655_v52 = vmax.f32 %v2653_v61, 0.0  ;;  %v2652_v5 = vadd.f32 %v2908_v37, %v2639_v62 }
0x1469   :  { %v2654_v8 = vmax.f32 %v2652_v5, 0.0  ;;  %v2739_v9 = vadd.f32 %v2735_v6, %v2655_v52 }
0x146b   :  { %v2738_v10 = vadd.f32 %v2730_v7, %v2654_v8  ;;  %v2741_v63 = vmax.f32 %v2739_v9, 0.0 }
0x146d   :  { %v2740_v11 = vmax.f32 %v2738_v10, 0.0 }
0x146f   :  { %3302 = vmatprep.mubr.msk.f32.mxu0 %vm702_vm8, %v2740_v11 }
0x1470   :  { %3303 = vmatmul.mubr.msk.f32.vlgmr.msra.gmra.mxu0 %vm702_vm8, %v2741_v63 }
0x1530   :  { %v3304_v0 = vpop.f32.mrf.mxu0 }
0x1531   :  { %v2829_v13 = vadd.f32 %v3304_v0, %v2912_v12 }
0x1532   :  { %v2823_v2 = vpop.f32.mrf.mxu0 }
0x1533   :  { %2833 = vst.msk [vmem:[#allocation7 + $0x8] sm:$0xff] %vm287_vm2, %v2829_v13  ;;  %v2824_v14 = vadd.f32 %v2912_v12, %v2823_v2 }
0x1535   :  { %2832 = vst.msk [vmem:[#allocation7] sm:$0xff] %vm287_vm2, %v2824_v14 }
0x1536   :  { %3421 = shalt.err (!%p3418_p0)
}
0x1537   :  { %2845 = dma.vmem_to_hbm [thread:$0]  %s2840_s22, 256, %s3714_s2, [#allocation4], %s3437_s12, %s3437_s12, %s3438_s13  }
0x1538   :  { %3434 = dma.done.wait [#allocation4], 256  }
0x1539   :  { %3435 = vsyncadd [#allocation4], 4294967040 }
0x153a   :  { %2849 = vsyncpa [#allocation3], 1 }
0x153b   :  { %2850 = vsyncpa [#allocation6], 1 }
0x153c   :  { %2851 = vsyncpa [#allocation4], 1 }

</bundles_post_ra>
